<compile_context>
chip_gen: v6e
topology: v6e:2x2x1
jax: 0.10.0
libtpu: 0.0.40
codegen_flags: <defaults>
</compile_context>

<pallas_src>
from functools import partial

import jax
import jax.numpy as jnp
from jax.experimental import pallas as pl
from jax.experimental.pallas import tpu as pltpu


# ----------------------------------------------------------------------------
# helpers
# ----------------------------------------------------------------------------
def _round_up(x, m):
    return (x + m - 1) // m * m


def _pick_tk(kp, max_tk=1024):
    """Largest multiple of 128 that divides kp and is <= max_tk."""
    if kp <= max_tk:
        return kp
    best = 128
    d = 256
    while d <= max_tk:
        if kp % d == 0:
            best = d
        d += 128
    return best


# ----------------------------------------------------------------------------
# Tiled fused matmul kernel:  O = leaky(A @ W + bias) [+ residual]
#   bf16 operands on the MXU, f32 accumulation in a VMEM scratch that stays
#   resident across the innermost ("arbitrary") K grid axis.
# ----------------------------------------------------------------------------
def _matmul_fused_kernel(*refs, slope, has_residual):
    if has_residual:
        x_ref, w_ref, b_ref, r_ref, o_ref, acc_ref = refs
    else:
        x_ref, w_ref, b_ref, o_ref, acc_ref = refs
        r_ref = None

    k = pl.program_id(2)

    @pl.when(k == 0)
    def _():
        acc_ref[...] = jnp.zeros_like(acc_ref)

    acc_ref[...] += jnp.dot(x_ref[...], w_ref[...],
                            preferred_element_type=jnp.float32)

    @pl.when(k == pl.num_programs(2) - 1)
    def _():
        y = acc_ref[...] + b_ref[...]                # bias (f32)
        if slope is not None:                        # fused LeakyReLU
            y = jnp.where(y >= 0.0, y, slope * y)
        if r_ref is not None:                        # fused residual add (zo2)
            y = y + r_ref[...]
        o_ref[...] = y.astype(o_ref.dtype)


def pallas_matmul_fused(x, w, b, *, slope=None, residual=None):
    """x:(M,K) f32, w:(K,N) f32, b:(N,) f32, residual:(M,N) f32 or None -> (M,N) f32."""
    M, K = x.shape
    K2, N = w.shape
    assert K == K2

    # Pad to MXU/lane-friendly shapes (zero padding contributes nothing).
    Mp = _round_up(M, 16) if M <= 128 else _round_up(M, 128)
    Np = _round_up(N, 128)
    Kp = _round_up(K, 128)
    tm = min(128, Mp)
    tn = 128
    tk = _pick_tk(Kp)

    xp = jnp.pad(x, ((0, Mp - M), (0, Kp - K))).astype(jnp.bfloat16)
    wp = jnp.pad(w, ((0, Kp - K), (0, Np - N))).astype(jnp.bfloat16)
    bp = jnp.pad(b, (0, Np - N)).astype(jnp.float32).reshape(1, Np)

    in_specs = [
        pl.BlockSpec((tm, tk), lambda i, j, k: (i, k)),
        pl.BlockSpec((tk, tn), lambda i, j, k: (k, j)),
        pl.BlockSpec((1, tn), lambda i, j, k: (0, j)),
    ]
    operands = [xp, wp, bp]
    has_residual = residual is not None
    if has_residual:
        rp = jnp.pad(residual, ((0, Mp - M), (0, Np - N))).astype(jnp.float32)
        in_specs.append(pl.BlockSpec((tm, tn), lambda i, j, k: (i, j)))
        operands.append(rp)

    out = pl.pallas_call(
        partial(_matmul_fused_kernel, slope=slope, has_residual=has_residual),
        out_shape=jax.ShapeDtypeStruct((Mp, Np), jnp.float32),
        grid_spec=pltpu.PrefetchScalarGridSpec(
            num_scalar_prefetch=0,
            grid=(Mp // tm, Np // tn, Kp // tk),
            in_specs=in_specs,
            out_specs=pl.BlockSpec((tm, tn), lambda i, j, k: (i, j)),
            scratch_shapes=[pltpu.VMEM((tm, tn), jnp.float32)],
        ),
        compiler_params=pltpu.CompilerParams(
            dimension_semantics=("parallel", "parallel", "arbitrary")),
    )(*operands)
    return out[:M, :N]


# ----------------------------------------------------------------------------
# Conv2d(k=5, pad=2, stride=2) via stride-2 im2col (glue) + Pallas matmul
# ----------------------------------------------------------------------------
def im2col_5x5_s2(x_nhwc):
    B, H, W, C = x_nhwc.shape
    Ho = (H + 4 - 5) // 2 + 1
    Wo = (W + 4 - 5) // 2 + 1
    xp = jnp.pad(x_nhwc, ((0, 0), (2, 2), (2, 2), (0, 0)))
    cols = []
    for ky in range(5):
        for kx in range(5):
            cols.append(xp[:, ky:ky + 2 * (Ho - 1) + 1:2,
                           kx:kx + 2 * (Wo - 1) + 1:2, :])
    patches = jnp.stack(cols, axis=3)                  # (B, Ho, Wo, 25, C)
    return patches.reshape(B * Ho * Wo, 25 * C), Ho, Wo


def conv5x5_s2(x_nhwc, w_oihw, bias, *, slope=None, residual=None):
    cin = x_nhwc.shape[-1]
    cout = w_oihw.shape[0]
    cols, Ho, Wo = im2col_5x5_s2(x_nhwc)
    # column order (ky, kx, cin): torch OIHW -> (ky, kx, cin, cout)
    w_mat = jnp.transpose(w_oihw, (2, 3, 1, 0)).reshape(25 * cin, cout)
    y = pallas_matmul_fused(cols, w_mat, bias, slope=slope, residual=residual)
    return y, Ho, Wo                                    # y: (B*Ho*Wo, cout)


# ----------------------------------------------------------------------------
# Full Disc_Low forward
# ----------------------------------------------------------------------------
def disc_low_forward(x_nchw, z, params, *, batch_size):
    B = batch_size
    nx = x_nchw.shape[-1]
    n1 = (nx + 4 - 5) // 2 + 1
    n2 = (n1 + 4 - 5) // 2 + 1
    n3 = (n2 + 4 - 5) // 2 + 1

    # zo2 branch: Linear -> LeakyReLU -> Linear -> LeakyReLU (both fused)
    h = pallas_matmul_fused(z, params["zo2_w1"], params["zo2_b1"], slope=0.02)
    zo2 = pallas_matmul_fused(h, params["zo2_w2"], params["zo2_b2"], slope=0.02)
    # PyTorch view(B,256,n2,n2) is NCHW; convert to our (B*n2*n2, 256) row layout
    zo2_res = jnp.transpose(zo2.reshape(B, 256, n2, n2),
                            (0, 2, 3, 1)).reshape(B * n2 * n2, 256)

    # Main conv path (NHWC internally)
    x = jnp.transpose(x_nchw, (0, 2, 3, 1))
    y1, H1, W1 = conv5x5_s2(x, params["c1_w"], params["c1_b"], slope=0.02)
    y1 = y1.reshape(B, H1, W1, 128)

    # Conv(128->256) + LeakyReLU + zo2 residual, all fused into one kernel
    y2, H2, W2 = conv5x5_s2(y1, params["c2_w"], params["c2_b"], slope=0.02,
                            residual=zo2_res)
    y2 = y2.reshape(B, H2, W2, 256)

    # l_end: Conv(256->1), no activation (Cout padded to 128 lanes internally)
    y3, H3, W3 = conv5x5_s2(y2, params["c3_w"], params["c3_b"])
    # rows are (b, h, w) -> matches PyTorch (B,1,H3,W3).view(B,-1)
    return y3.reshape(B, H3 * W3)


# ----------------------------------------------------------------------------
# Deterministic synthetic parameters
# ----------------------------------------------------------------------------
def init_params(key, nz, nconv2):
    ks = jax.random.split(key, 10)

    def n(k, shape, scale=0.05):
        return (scale * jax.random.normal(k, shape)).astype(jnp.float32)

    return {
        "zo2_w1": n(ks[0], (nz, 512)),
        "zo2_b1": n(ks[1], (512,)),
        "zo2_w2": n(ks[2], (512, 256 * nconv2 * nconv2)),
        "zo2_b2": n(ks[3], (256 * nconv2 * nconv2,)),
        "c1_w": n(ks[4], (128, 3, 5, 5)),      # torch OIHW
        "c1_b": n(ks[5], (128,)),
        "c2_w": n(ks[6], (256, 128, 5, 5)),
        "c2_b": n(ks[7], (256,)),
        "c3_w": n(ks[8], (1, 256, 5, 5)),      # l_end
        "c3_b": n(ks[9], (1,)),
        # zo3 branch exists in the PyTorch module but is unused in forward().
    }


if __name__ == "__main__":
    batch_size, nx, nz = 2, 16, 64
    n1 = (nx + 4 - 5) // 2 + 1
    n2 = (n1 + 4 - 5) // 2 + 1
    n3 = (n2 + 4 - 5) // 2 + 1

    key = jax.random.PRNGKey(0)
    kp, kx, kz = jax.random.split(key, 3)
    params = init_params(kp, nz, n2)
    x = jax.random.normal(kx, (batch_size, 3, nx, nx), dtype=jnp.float32)
    z = jax.random.normal(kz, (batch_size, nz), dtype=jnp.float32)

    fwd = jax.jit(partial(disc_low_forward, batch_size=batch_size))
    out = fwd(x, z, params)
    out = jax.block_until_ready(out)

    assert out.shape == (batch_size, n3 * n3), out.shape
    assert out.dtype == jnp.float32
    assert bool(jnp.all(jnp.isfinite(out)))
    print("KERNEL_OK")
</pallas_src>

<mosaic_0001>
module attributes {stable_mosaic.version = 11 : i64} {
  func.func @_matmul_fused_kernel(%arg0: i32, %arg1: i32, %arg2: i32, %arg3: memref<128x128xbf16, #tpu.memory_space<vmem>>, %arg4: memref<128x128xbf16, #tpu.memory_space<vmem>>, %arg5: memref<1x128xf32, #tpu.memory_space<vmem>>, %arg6: memref<128x128xf32, #tpu.memory_space<vmem>>, %arg7: memref<128x128xf32, #tpu.memory_space<vmem>>) attributes {dimension_semantics = [#tpu.dimension_semantics<parallel>, #tpu.dimension_semantics<parallel>, #tpu.dimension_semantics<arbitrary>], iteration_bounds = array<i64: 1, 1, 1>, scalar_prefetch = 0 : i64, scratch_operands = 1 : i64, tpu.core_type = #tpu.core_type<tc>, window_params = [{transform_indices = @transform_0, window_bounds = array<i64: 128, 128>}, {transform_indices = @transform_1, window_bounds = array<i64: 128, 128>}, {transform_indices = @transform_2, window_bounds = array<i64: 1, 128>}, {transform_indices = @transform_3, window_bounds = array<i64: 128, 128>}]} {
    %c0_i32 = arith.constant 0 : i32
    %0 = arith.cmpi eq, %arg2, %c0_i32 : i32
    %1 = arith.extui %0 : i1 to i32
    %c0_i32_0 = arith.constant 0 : i32
    %2 = arith.cmpi ne, %1, %c0_i32_0 : i32
    scf.if %2 {
      %cst_10 = arith.constant 0.000000e+00 : f32
      %12 = vector.broadcast %cst_10 : f32 to vector<128x128xf32>
      %c0_11 = arith.constant 0 : index
      %c0_12 = arith.constant 0 : index
      %13 = vector.load %arg7[%c0_11, %c0_12] : memref<128x128xf32, #tpu.memory_space<vmem>>, vector<128x128xf32>
      tpu.vector_store %arg7[%c0_11, %c0_12], %12 {strides = array<i32>} : memref<128x128xf32, #tpu.memory_space<vmem>>, vector<128x128xf32>,
    } else {
    }
    %c0 = arith.constant 0 : index
    %c0_1 = arith.constant 0 : index
    %3 = vector.load %arg7[%c0, %c0_1] : memref<128x128xf32, #tpu.memory_space<vmem>>, vector<128x128xf32>
    %c0_2 = arith.constant 0 : index
    %c0_3 = arith.constant 0 : index
    %4 = vector.load %arg3[%c0_2, %c0_3] : memref<128x128xbf16, #tpu.memory_space<vmem>>, vector<128x128xbf16>
    %c0_4 = arith.constant 0 : index
    %c0_5 = arith.constant 0 : index
    %5 = vector.load %arg4[%c0_4, %c0_5] : memref<128x128xbf16, #tpu.memory_space<vmem>>, vector<128x128xbf16>
    %cst = arith.constant dense<0.000000e+00> : vector<128x128xf32>
    %6 = tpu.matmul %4, %5, %cst {dimension_numbers = #tpu.dot_dimension_numbers<[1], [0], [0], [1], [0, 0, 1, 1], [], []>} : vector<128x128xbf16>, vector<128x128xbf16>, vector<128x128xf32> -> vector<128x128xf32>
    %7 = arith.addf %3, %6 : vector<128x128xf32>
    %c0_6 = arith.constant 0 : index
    %c0_7 = arith.constant 0 : index
    %8 = vector.load %arg7[%c0_6, %c0_7] : memref<128x128xf32, #tpu.memory_space<vmem>>, vector<128x128xf32>
    tpu.vector_store %arg7[%c0_6, %c0_7], %7 {strides = array<i32>} : memref<128x128xf32, #tpu.memory_space<vmem>>, vector<128x128xf32>,
    %c0_i32_8 = arith.constant 0 : i32
    %9 = arith.cmpi eq, %arg2, %c0_i32_8 : i32
    %10 = arith.extui %9 : i1 to i32
    %c0_i32_9 = arith.constant 0 : i32
    %11 = arith.cmpi ne, %10, %c0_i32_9 : i32
    scf.if %11 {
      %c0_10 = arith.constant 0 : index
      %c0_11 = arith.constant 0 : index
      %12 = vector.load %arg7[%c0_10, %c0_11] : memref<128x128xf32, #tpu.memory_space<vmem>>, vector<128x128xf32>
      %c0_12 = arith.constant 0 : index
      %c0_13 = arith.constant 0 : index
      %13 = vector.load %arg5[%c0_12, %c0_13] : memref<1x128xf32, #tpu.memory_space<vmem>>, vector<1x128xf32>
      %14 = vector.broadcast %13 : vector<1x128xf32> to vector<128x128xf32>
      %15 = arith.addf %12, %14 : vector<128x128xf32>
      %cst_14 = arith.constant 0.000000e+00 : f32
      %16 = vector.broadcast %cst_14 : f32 to vector<128x128xf32>
      %17 = arith.cmpf oge, %15, %16 : vector<128x128xf32>
      %cst_15 = arith.constant 2.000000e-02 : f32
      %18 = vector.broadcast %cst_15 : f32 to vector<128x128xf32>
      %19 = arith.mulf %18, %15 : vector<128x128xf32>
      %20 = arith.select %17, %15, %19 : vector<128x128xi1>, vector<128x128xf32>
      %c0_16 = arith.constant 0 : index
      %c0_17 = arith.constant 0 : index
      %21 = vector.load %arg6[%c0_16, %c0_17] : memref<128x128xf32, #tpu.memory_space<vmem>>, vector<128x128xf32>
      tpu.vector_store %arg6[%c0_16, %c0_17], %20 {strides = array<i32>} : memref<128x128xf32, #tpu.memory_space<vmem>>, vector<128x128xf32>,
    } else {
    }
    return
  }
  func.func @transform_0(%arg0: i32, %arg1: i32, %arg2: i32) -> (i32, i32) {
    %c0_i32 = arith.constant 0 : i32
    return %arg0, %arg2 : i32, i32
  }
  func.func @transform_1(%arg0: i32, %arg1: i32, %arg2: i32) -> (i32, i32) {
    %c0_i32 = arith.constant 0 : i32
    return %arg2, %arg1 : i32, i32
  }
  func.func @transform_2(%arg0: i32, %arg1: i32, %arg2: i32) -> (i32, i32) {
    %c0_i32 = arith.constant 0 : i32
    %c0_i32_0 = arith.constant 0 : i32
    return %c0_i32, %arg1 : i32, i32
  }
  func.func @transform_3(%arg0: i32, %arg1: i32, %arg2: i32) -> (i32, i32) {
    %c0_i32 = arith.constant 0 : i32
    return %arg0, %arg1 : i32, i32
  }
}

module attributes {stable_mosaic.version = 11 : i64} {
  func.func @_matmul_fused_kernel(%arg0: i32, %arg1: i32, %arg2: i32, %arg3: memref<16x512xbf16, #tpu.memory_space<vmem>>, %arg4: memref<512x128xbf16, #tpu.memory_space<vmem>>, %arg5: memref<1x128xf32, #tpu.memory_space<vmem>>, %arg6: memref<16x128xf32, #tpu.memory_space<vmem>>, %arg7: memref<16x128xf32, #tpu.memory_space<vmem>>) attributes {dimension_semantics = [#tpu.dimension_semantics<parallel>, #tpu.dimension_semantics<parallel>, #tpu.dimension_semantics<arbitrary>], iteration_bounds = array<i64: 1, 32, 1>, scalar_prefetch = 0 : i64, scratch_operands = 1 : i64, tpu.core_type = #tpu.core_type<tc>, window_params = [{transform_indices = @transform_0, window_bounds = array<i64: 16, 512>}, {transform_indices = @transform_1, window_bounds = array<i64: 512, 128>}, {transform_indices = @transform_2, window_bounds = array<i64: 1, 128>}, {transform_indices = @transform_3, window_bounds = array<i64: 16, 128>}]} {
    %c0_i32 = arith.constant 0 : i32
    %0 = arith.cmpi eq, %arg2, %c0_i32 : i32
    %1 = arith.extui %0 : i1 to i32
    %c0_i32_0 = arith.constant 0 : i32
    %2 = arith.cmpi ne, %1, %c0_i32_0 : i32
    scf.if %2 {
      %cst_10 = arith.constant 0.000000e+00 : f32
      %12 = vector.broadcast %cst_10 : f32 to vector<16x128xf32>
      %c0_11 = arith.constant 0 : index
      %c0_12 = arith.constant 0 : index
      %13 = vector.load %arg7[%c0_11, %c0_12] : memref<16x128xf32, #tpu.memory_space<vmem>>, vector<16x128xf32>
      tpu.vector_store %arg7[%c0_11, %c0_12], %12 {strides = array<i32>} : memref<16x128xf32, #tpu.memory_space<vmem>>, vector<16x128xf32>,
    } else {
    }
    %c0 = arith.constant 0 : index
    %c0_1 = arith.constant 0 : index
    %3 = vector.load %arg7[%c0, %c0_1] : memref<16x128xf32, #tpu.memory_space<vmem>>, vector<16x128xf32>
    %c0_2 = arith.constant 0 : index
    %c0_3 = arith.constant 0 : index
    %4 = vector.load %arg3[%c0_2, %c0_3] : memref<16x512xbf16, #tpu.memory_space<vmem>>, vector<16x512xbf16>
    %c0_4 = arith.constant 0 : index
    %c0_5 = arith.constant 0 : index
    %5 = vector.load %arg4[%c0_4, %c0_5] : memref<512x128xbf16, #tpu.memory_space<vmem>>, vector<512x128xbf16>
    %cst = arith.constant dense<0.000000e+00> : vector<16x128xf32>
    %6 = tpu.matmul %4, %5, %cst {dimension_numbers = #tpu.dot_dimension_numbers<[1], [0], [0], [1], [0, 0, 1, 1], [], []>} : vector<16x512xbf16>, vector<512x128xbf16>, vector<16x128xf32> -> vector<16x128xf32>
    %7 = arith.addf %3, %6 : vector<16x128xf32>
    %c0_6 = arith.constant 0 : index
    %c0_7 = arith.constant 0 : index
    %8 = vector.load %arg7[%c0_6, %c0_7] : memref<16x128xf32, #tpu.memory_space<vmem>>, vector<16x128xf32>
    tpu.vector_store %arg7[%c0_6, %c0_7], %7 {strides = array<i32>} : memref<16x128xf32, #tpu.memory_space<vmem>>, vector<16x128xf32>,
    %c0_i32_8 = arith.constant 0 : i32
    %9 = arith.cmpi eq, %arg2, %c0_i32_8 : i32
    %10 = arith.extui %9 : i1 to i32
    %c0_i32_9 = arith.constant 0 : i32
    %11 = arith.cmpi ne, %10, %c0_i32_9 : i32
    scf.if %11 {
      %c0_10 = arith.constant 0 : index
      %c0_11 = arith.constant 0 : index
      %12 = vector.load %arg7[%c0_10, %c0_11] : memref<16x128xf32, #tpu.memory_space<vmem>>, vector<16x128xf32>
      %c0_12 = arith.constant 0 : index
      %c0_13 = arith.constant 0 : index
      %13 = vector.load %arg5[%c0_12, %c0_13] : memref<1x128xf32, #tpu.memory_space<vmem>>, vector<1x128xf32>
      %14 = vector.broadcast %13 : vector<1x128xf32> to vector<16x128xf32>
      %15 = arith.addf %12, %14 : vector<16x128xf32>
      %cst_14 = arith.constant 0.000000e+00 : f32
      %16 = vector.broadcast %cst_14 : f32 to vector<16x128xf32>
      %17 = arith.cmpf oge, %15, %16 : vector<16x128xf32>
      %cst_15 = arith.constant 2.000000e-02 : f32
      %18 = vector.broadcast %cst_15 : f32 to vector<16x128xf32>
      %19 = arith.mulf %18, %15 : vector<16x128xf32>
      %20 = arith.select %17, %15, %19 : vector<16x128xi1>, vector<16x128xf32>
      %c0_16 = arith.constant 0 : index
      %c0_17 = arith.constant 0 : index
      %21 = vector.load %arg6[%c0_16, %c0_17] : memref<16x128xf32, #tpu.memory_space<vmem>>, vector<16x128xf32>
      tpu.vector_store %arg6[%c0_16, %c0_17], %20 {strides = array<i32>} : memref<16x128xf32, #tpu.memory_space<vmem>>, vector<16x128xf32>,
    } else {
    }
    return
  }
  func.func @transform_0(%arg0: i32, %arg1: i32, %arg2: i32) -> (i32, i32) {
    %c0_i32 = arith.constant 0 : i32
    return %arg0, %arg2 : i32, i32
  }
  func.func @transform_1(%arg0: i32, %arg1: i32, %arg2: i32) -> (i32, i32) {
    %c0_i32 = arith.constant 0 : i32
    return %arg2, %arg1 : i32, i32
  }
  func.func @transform_2(%arg0: i32, %arg1: i32, %arg2: i32) -> (i32, i32) {
    %c0_i32 = arith.constant 0 : i32
    %c0_i32_0 = arith.constant 0 : i32
    return %c0_i32, %arg1 : i32, i32
  }
  func.func @transform_3(%arg0: i32, %arg1: i32, %arg2: i32) -> (i32, i32) {
    %c0_i32 = arith.constant 0 : i32
    return %arg0, %arg1 : i32, i32
  }
}

module attributes {stable_mosaic.version = 11 : i64} {
  func.func @_matmul_fused_kernel(%arg0: i32, %arg1: i32, %arg2: i32, %arg3: memref<16x128xbf16, #tpu.memory_space<vmem>>, %arg4: memref<128x128xbf16, #tpu.memory_space<vmem>>, %arg5: memref<1x128xf32, #tpu.memory_space<vmem>>, %arg6: memref<16x128xf32, #tpu.memory_space<vmem>>, %arg7: memref<16x128xf32, #tpu.memory_space<vmem>>) attributes {dimension_semantics = [#tpu.dimension_semantics<parallel>, #tpu.dimension_semantics<parallel>, #tpu.dimension_semantics<arbitrary>], iteration_bounds = array<i64: 1, 4, 1>, scalar_prefetch = 0 : i64, scratch_operands = 1 : i64, tpu.core_type = #tpu.core_type<tc>, window_params = [{transform_indices = @transform_0, window_bounds = array<i64: 16, 128>}, {transform_indices = @transform_1, window_bounds = array<i64: 128, 128>}, {transform_indices = @transform_2, window_bounds = array<i64: 1, 128>}, {transform_indices = @transform_3, window_bounds = array<i64: 16, 128>}]} {
    %c0_i32 = arith.constant 0 : i32
    %0 = arith.cmpi eq, %arg2, %c0_i32 : i32
    %1 = arith.extui %0 : i1 to i32
    %c0_i32_0 = arith.constant 0 : i32
    %2 = arith.cmpi ne, %1, %c0_i32_0 : i32
    scf.if %2 {
      %cst_10 = arith.constant 0.000000e+00 : f32
      %12 = vector.broadcast %cst_10 : f32 to vector<16x128xf32>
      %c0_11 = arith.constant 0 : index
      %c0_12 = arith.constant 0 : index
      %13 = vector.load %arg7[%c0_11, %c0_12] : memref<16x128xf32, #tpu.memory_space<vmem>>, vector<16x128xf32>
      tpu.vector_store %arg7[%c0_11, %c0_12], %12 {strides = array<i32>} : memref<16x128xf32, #tpu.memory_space<vmem>>, vector<16x128xf32>,
    } else {
    }
    %c0 = arith.constant 0 : index
    %c0_1 = arith.constant 0 : index
    %3 = vector.load %arg7[%c0, %c0_1] : memref<16x128xf32, #tpu.memory_space<vmem>>, vector<16x128xf32>
    %c0_2 = arith.constant 0 : index
    %c0_3 = arith.constant 0 : index
    %4 = vector.load %arg3[%c0_2, %c0_3] : memref<16x128xbf16, #tpu.memory_space<vmem>>, vector<16x128xbf16>
    %c0_4 = arith.constant 0 : index
    %c0_5 = arith.constant 0 : index
    %5 = vector.load %arg4[%c0_4, %c0_5] : memref<128x128xbf16, #tpu.memory_space<vmem>>, vector<128x128xbf16>
    %cst = arith.constant dense<0.000000e+00> : vector<16x128xf32>
    %6 = tpu.matmul %4, %5, %cst {dimension_numbers = #tpu.dot_dimension_numbers<[1], [0], [0], [1], [0, 0, 1, 1], [], []>} : vector<16x128xbf16>, vector<128x128xbf16>, vector<16x128xf32> -> vector<16x128xf32>
    %7 = arith.addf %3, %6 : vector<16x128xf32>
    %c0_6 = arith.constant 0 : index
    %c0_7 = arith.constant 0 : index
    %8 = vector.load %arg7[%c0_6, %c0_7] : memref<16x128xf32, #tpu.memory_space<vmem>>, vector<16x128xf32>
    tpu.vector_store %arg7[%c0_6, %c0_7], %7 {strides = array<i32>} : memref<16x128xf32, #tpu.memory_space<vmem>>, vector<16x128xf32>,
    %c0_i32_8 = arith.constant 0 : i32
    %9 = arith.cmpi eq, %arg2, %c0_i32_8 : i32
    %10 = arith.extui %9 : i1 to i32
    %c0_i32_9 = arith.constant 0 : i32
    %11 = arith.cmpi ne, %10, %c0_i32_9 : i32
    scf.if %11 {
      %c0_10 = arith.constant 0 : index
      %c0_11 = arith.constant 0 : index
      %12 = vector.load %arg7[%c0_10, %c0_11] : memref<16x128xf32, #tpu.memory_space<vmem>>, vector<16x128xf32>
      %c0_12 = arith.constant 0 : index
      %c0_13 = arith.constant 0 : index
      %13 = vector.load %arg5[%c0_12, %c0_13] : memref<1x128xf32, #tpu.memory_space<vmem>>, vector<1x128xf32>
      %14 = vector.broadcast %13 : vector<1x128xf32> to vector<16x128xf32>
      %15 = arith.addf %12, %14 : vector<16x128xf32>
      %cst_14 = arith.constant 0.000000e+00 : f32
      %16 = vector.broadcast %cst_14 : f32 to vector<16x128xf32>
      %17 = arith.cmpf oge, %15, %16 : vector<16x128xf32>
      %cst_15 = arith.constant 2.000000e-02 : f32
      %18 = vector.broadcast %cst_15 : f32 to vector<16x128xf32>
      %19 = arith.mulf %18, %15 : vector<16x128xf32>
      %20 = arith.select %17, %15, %19 : vector<16x128xi1>, vector<16x128xf32>
      %c0_16 = arith.constant 0 : index
      %c0_17 = arith.constant 0 : index
      %21 = vector.load %arg6[%c0_16, %c0_17] : memref<16x128xf32, #tpu.memory_space<vmem>>, vector<16x128xf32>
      tpu.vector_store %arg6[%c0_16, %c0_17], %20 {strides = array<i32>} : memref<16x128xf32, #tpu.memory_space<vmem>>, vector<16x128xf32>,
    } else {
    }
    return
  }
  func.func @transform_0(%arg0: i32, %arg1: i32, %arg2: i32) -> (i32, i32) {
    %c0_i32 = arith.constant 0 : i32
    return %arg0, %arg2 : i32, i32
  }
  func.func @transform_1(%arg0: i32, %arg1: i32, %arg2: i32) -> (i32, i32) {
    %c0_i32 = arith.constant 0 : i32
    return %arg2, %arg1 : i32, i32
  }
  func.func @transform_2(%arg0: i32, %arg1: i32, %arg2: i32) -> (i32, i32) {
    %c0_i32 = arith.constant 0 : i32
    %c0_i32_0 = arith.constant 0 : i32
    return %c0_i32, %arg1 : i32, i32
  }
  func.func @transform_3(%arg0: i32, %arg1: i32, %arg2: i32) -> (i32, i32) {
    %c0_i32 = arith.constant 0 : i32
    return %arg0, %arg1 : i32, i32
  }
}

module attributes {stable_mosaic.version = 11 : i64} {
  func.func @_matmul_fused_kernel(%arg0: i32, %arg1: i32, %arg2: i32, %arg3: memref<32x640xbf16, #tpu.memory_space<vmem>>, %arg4: memref<640x128xbf16, #tpu.memory_space<vmem>>, %arg5: memref<1x128xf32, #tpu.memory_space<vmem>>, %arg6: memref<32x128xf32, #tpu.memory_space<vmem>>, %arg7: memref<32x128xf32, #tpu.memory_space<vmem>>, %arg8: memref<32x128xf32, #tpu.memory_space<vmem>>) attributes {dimension_semantics = [#tpu.dimension_semantics<parallel>, #tpu.dimension_semantics<parallel>, #tpu.dimension_semantics<arbitrary>], iteration_bounds = array<i64: 1, 2, 5>, scalar_prefetch = 0 : i64, scratch_operands = 1 : i64, tpu.core_type = #tpu.core_type<tc>, window_params = [{transform_indices = @transform_0, window_bounds = array<i64: 32, 640>}, {transform_indices = @transform_1, window_bounds = array<i64: 640, 128>}, {transform_indices = @transform_2, window_bounds = array<i64: 1, 128>}, {transform_indices = @transform_3, window_bounds = array<i64: 32, 128>}, {transform_indices = @transform_4, window_bounds = array<i64: 32, 128>}]} {
    %c0_i32 = arith.constant 0 : i32
    %0 = arith.cmpi eq, %arg2, %c0_i32 : i32
    %1 = arith.extui %0 : i1 to i32
    %c0_i32_0 = arith.constant 0 : i32
    %2 = arith.cmpi ne, %1, %c0_i32_0 : i32
    scf.if %2 {
      %cst_9 = arith.constant 0.000000e+00 : f32
      %12 = vector.broadcast %cst_9 : f32 to vector<32x128xf32>
      %c0_10 = arith.constant 0 : index
      %c0_11 = arith.constant 0 : index
      %13 = vector.load %arg8[%c0_10, %c0_11] : memref<32x128xf32, #tpu.memory_space<vmem>>, vector<32x128xf32>
      tpu.vector_store %arg8[%c0_10, %c0_11], %12 {strides = array<i32>} : memref<32x128xf32, #tpu.memory_space<vmem>>, vector<32x128xf32>,
    } else {
    }
    %c0 = arith.constant 0 : index
    %c0_1 = arith.constant 0 : index
    %3 = vector.load %arg8[%c0, %c0_1] : memref<32x128xf32, #tpu.memory_space<vmem>>, vector<32x128xf32>
    %c0_2 = arith.constant 0 : index
    %c0_3 = arith.constant 0 : index
    %4 = vector.load %arg3[%c0_2, %c0_3] : memref<32x640xbf16, #tpu.memory_space<vmem>>, vector<32x640xbf16>
    %c0_4 = arith.constant 0 : index
    %c0_5 = arith.constant 0 : index
    %5 = vector.load %arg4[%c0_4, %c0_5] : memref<640x128xbf16, #tpu.memory_space<vmem>>, vector<640x128xbf16>
    %cst = arith.constant dense<0.000000e+00> : vector<32x128xf32>
    %6 = tpu.matmul %4, %5, %cst {dimension_numbers = #tpu.dot_dimension_numbers<[1], [0], [0], [1], [0, 0, 1, 1], [], []>} : vector<32x640xbf16>, vector<640x128xbf16>, vector<32x128xf32> -> vector<32x128xf32>
    %7 = arith.addf %3, %6 : vector<32x128xf32>
    %c0_6 = arith.constant 0 : index
    %c0_7 = arith.constant 0 : index
    %8 = vector.load %arg8[%c0_6, %c0_7] : memref<32x128xf32, #tpu.memory_space<vmem>>, vector<32x128xf32>
    tpu.vector_store %arg8[%c0_6, %c0_7], %7 {strides = array<i32>} : memref<32x128xf32, #tpu.memory_space<vmem>>, vector<32x128xf32>,
    %c4_i32 = arith.constant 4 : i32
    %9 = arith.cmpi eq, %arg2, %c4_i32 : i32
    %10 = arith.extui %9 : i1 to i32
    %c0_i32_8 = arith.constant 0 : i32
    %11 = arith.cmpi ne, %10, %c0_i32_8 : i32
    scf.if %11 {
      %c0_9 = arith.constant 0 : index
      %c0_10 = arith.constant 0 : index
      %12 = vector.load %arg8[%c0_9, %c0_10] : memref<32x128xf32, #tpu.memory_space<vmem>>, vector<32x128xf32>
      %c0_11 = arith.constant 0 : index
      %c0_12 = arith.constant 0 : index
      %13 = vector.load %arg5[%c0_11, %c0_12] : memref<1x128xf32, #tpu.memory_space<vmem>>, vector<1x128xf32>
      %14 = vector.broadcast %13 : vector<1x128xf32> to vector<32x128xf32>
      %15 = arith.addf %12, %14 : vector<32x128xf32>
      %cst_13 = arith.constant 0.000000e+00 : f32
      %16 = vector.broadcast %cst_13 : f32 to vector<32x128xf32>
      %17 = arith.cmpf oge, %15, %16 : vector<32x128xf32>
      %cst_14 = arith.constant 2.000000e-02 : f32
      %18 = vector.broadcast %cst_14 : f32 to vector<32x128xf32>
      %19 = arith.mulf %18, %15 : vector<32x128xf32>
      %20 = arith.select %17, %15, %19 : vector<32x128xi1>, vector<32x128xf32>
      %c0_15 = arith.constant 0 : index
      %c0_16 = arith.constant 0 : index
      %21 = vector.load %arg6[%c0_15, %c0_16] : memref<32x128xf32, #tpu.memory_space<vmem>>, vector<32x128xf32>
      %22 = arith.addf %20, %21 : vector<32x128xf32>
      %c0_17 = arith.constant 0 : index
      %c0_18 = arith.constant 0 : index
      %23 = vector.load %arg7[%c0_17, %c0_18] : memref<32x128xf32, #tpu.memory_space<vmem>>, vector<32x128xf32>
      tpu.vector_store %arg7[%c0_17, %c0_18], %22 {strides = array<i32>} : memref<32x128xf32, #tpu.memory_space<vmem>>, vector<32x128xf32>,
    } else {
    }
    return
  }
  func.func @transform_0(%arg0: i32, %arg1: i32, %arg2: i32) -> (i32, i32) {
    %c0_i32 = arith.constant 0 : i32
    return %arg0, %arg2 : i32, i32
  }
  func.func @transform_1(%arg0: i32, %arg1: i32, %arg2: i32) -> (i32, i32) {
    %c0_i32 = arith.constant 0 : i32
    return %arg2, %arg1 : i32, i32
  }
  func.func @transform_2(%arg0: i32, %arg1: i32, %arg2: i32) -> (i32, i32) {
    %c0_i32 = arith.constant 0 : i32
    %c0_i32_0 = arith.constant 0 : i32
    return %c0_i32, %arg1 : i32, i32
  }
  func.func @transform_3(%arg0: i32, %arg1: i32, %arg2: i32) -> (i32, i32) {
    %c0_i32 = arith.constant 0 : i32
    return %arg0, %arg1 : i32, i32
  }
  func.func @transform_4(%arg0: i32, %arg1: i32, %arg2: i32) -> (i32, i32) {
    %c0_i32 = arith.constant 0 : i32
    return %arg0, %arg1 : i32, i32
  }
}

module attributes {stable_mosaic.version = 11 : i64} {
  func.func @_matmul_fused_kernel(%arg0: i32, %arg1: i32, %arg2: i32, %arg3: memref<16x640xbf16, #tpu.memory_space<vmem>>, %arg4: memref<640x128xbf16, #tpu.memory_space<vmem>>, %arg5: memref<1x128xf32, #tpu.memory_space<vmem>>, %arg6: memref<16x128xf32, #tpu.memory_space<vmem>>, %arg7: memref<16x128xf32, #tpu.memory_space<vmem>>) attributes {dimension_semantics = [#tpu.dimension_semantics<parallel>, #tpu.dimension_semantics<parallel>, #tpu.dimension_semantics<arbitrary>], iteration_bounds = array<i64: 1, 1, 10>, scalar_prefetch = 0 : i64, scratch_operands = 1 : i64, tpu.core_type = #tpu.core_type<tc>, window_params = [{transform_indices = @transform_0, window_bounds = array<i64: 16, 640>}, {transform_indices = @transform_1, window_bounds = array<i64: 640, 128>}, {transform_indices = @transform_2, window_bounds = array<i64: 1, 128>}, {transform_indices = @transform_3, window_bounds = array<i64: 16, 128>}]} {
    %c0_i32 = arith.constant 0 : i32
    %0 = arith.cmpi eq, %arg2, %c0_i32 : i32
    %1 = arith.extui %0 : i1 to i32
    %c0_i32_0 = arith.constant 0 : i32
    %2 = arith.cmpi ne, %1, %c0_i32_0 : i32
    scf.if %2 {
      %cst_9 = arith.constant 0.000000e+00 : f32
      %12 = vector.broadcast %cst_9 : f32 to vector<16x128xf32>
      %c0_10 = arith.constant 0 : index
      %c0_11 = arith.constant 0 : index
      %13 = vector.load %arg7[%c0_10, %c0_11] : memref<16x128xf32, #tpu.memory_space<vmem>>, vector<16x128xf32>
      tpu.vector_store %arg7[%c0_10, %c0_11], %12 {strides = array<i32>} : memref<16x128xf32, #tpu.memory_space<vmem>>, vector<16x128xf32>,
    } else {
    }
    %c0 = arith.constant 0 : index
    %c0_1 = arith.constant 0 : index
    %3 = vector.load %arg7[%c0, %c0_1] : memref<16x128xf32, #tpu.memory_space<vmem>>, vector<16x128xf32>
    %c0_2 = arith.constant 0 : index
    %c0_3 = arith.constant 0 : index
    %4 = vector.load %arg3[%c0_2, %c0_3] : memref<16x640xbf16, #tpu.memory_space<vmem>>, vector<16x640xbf16>
    %c0_4 = arith.constant 0 : index
    %c0_5 = arith.constant 0 : index
    %5 = vector.load %arg4[%c0_4, %c0_5] : memref<640x128xbf16, #tpu.memory_space<vmem>>, vector<640x128xbf16>
    %cst = arith.constant dense<0.000000e+00> : vector<16x128xf32>
    %6 = tpu.matmul %4, %5, %cst {dimension_numbers = #tpu.dot_dimension_numbers<[1], [0], [0], [1], [0, 0, 1, 1], [], []>} : vector<16x640xbf16>, vector<640x128xbf16>, vector<16x128xf32> -> vector<16x128xf32>
    %7 = arith.addf %3, %6 : vector<16x128xf32>
    %c0_6 = arith.constant 0 : index
    %c0_7 = arith.constant 0 : index
    %8 = vector.load %arg7[%c0_6, %c0_7] : memref<16x128xf32, #tpu.memory_space<vmem>>, vector<16x128xf32>
    tpu.vector_store %arg7[%c0_6, %c0_7], %7 {strides = array<i32>} : memref<16x128xf32, #tpu.memory_space<vmem>>, vector<16x128xf32>,
    %c9_i32 = arith.constant 9 : i32
    %9 = arith.cmpi eq, %arg2, %c9_i32 : i32
    %10 = arith.extui %9 : i1 to i32
    %c0_i32_8 = arith.constant 0 : i32
    %11 = arith.cmpi ne, %10, %c0_i32_8 : i32
    scf.if %11 {
      %c0_9 = arith.constant 0 : index
      %c0_10 = arith.constant 0 : index
      %12 = vector.load %arg7[%c0_9, %c0_10] : memref<16x128xf32, #tpu.memory_space<vmem>>, vector<16x128xf32>
      %c0_11 = arith.constant 0 : index
      %c0_12 = arith.constant 0 : index
      %13 = vector.load %arg5[%c0_11, %c0_12] : memref<1x128xf32, #tpu.memory_space<vmem>>, vector<1x128xf32>
      %14 = vector.broadcast %13 : vector<1x128xf32> to vector<16x128xf32>
      %15 = arith.addf %12, %14 : vector<16x128xf32>
      %c0_13 = arith.constant 0 : index
      %c0_14 = arith.constant 0 : index
      %16 = vector.load %arg6[%c0_13, %c0_14] : memref<16x128xf32, #tpu.memory_space<vmem>>, vector<16x128xf32>
      tpu.vector_store %arg6[%c0_13, %c0_14], %15 {strides = array<i32>} : memref<16x128xf32, #tpu.memory_space<vmem>>, vector<16x128xf32>,
    } else {
    }
    return
  }
  func.func @transform_0(%arg0: i32, %arg1: i32, %arg2: i32) -> (i32, i32) {
    %c0_i32 = arith.constant 0 : i32
    return %arg0, %arg2 : i32, i32
  }
  func.func @transform_1(%arg0: i32, %arg1: i32, %arg2: i32) -> (i32, i32) {
    %c0_i32 = arith.constant 0 : i32
    return %arg2, %arg1 : i32, i32
  }
  func.func @transform_2(%arg0: i32, %arg1: i32, %arg2: i32) -> (i32, i32) {
    %c0_i32 = arith.constant 0 : i32
    %c0_i32_0 = arith.constant 0 : i32
    return %c0_i32, %arg1 : i32, i32
  }
  func.func @transform_3(%arg0: i32, %arg1: i32, %arg2: i32) -> (i32, i32) {
    %c0_i32 = arith.constant 0 : i32
    return %arg0, %arg1 : i32, i32
  }
}

</mosaic_0001>

<bundles_post_ra>
// kernel: disc_low_forward.7
= control target key start
LH: loop header
LB: loop body
LE: loop exit
PB: predicated region body
PF: predicated region fallthrough
CT: control target
= control target key end

     0   :  { %s652_s1 = inlined_call_operand.vmem [shape: bf16[128,128], index: 1, kind: input, shape index: {}]   ;;  %s653_s0 = inlined_call_operand.vmem [shape: bf16[128,128], index: 0, kind: input, shape index: {}]   ;;  %s654_s2 = inlined_call_operand.vmem [shape: f32[1,128], index: 2, kind: input, shape index: {}]   ;;  %s655_s3 = inlined_call_operand.vmem [shape: f32[128,128], index: 3, kind: output, shape index: {}]  }
   0x1   :  { %v499_v0 = vld [vmem:[%s652_s1 + $0x38] sm:$0xff]   ;;  %v500_v1 = vld [vmem:[%s652_s1 + $0x30] sm:$0xff]   ;;  %v501_v2 = vld [vmem:[%s652_s1 + $0x28] sm:$0xff]  }
   0x2   :  { %451 = vmatprep.subr.bf16.mxu0 %v499_v0  ;;  %483 = vmatprep.subr.bf16.mxu1 %v499_v0  ;;  %v502_v3 = vld [vmem:[%s652_s1 + $0x20] sm:$0xff]   ;;  %v503_v6 = vld [vmem:[%s652_s1 + $0x18] sm:$0xff]   ;;  %v504_v7 = vld [vmem:[%s652_s1 + $0x10] sm:$0xff]  }
   0x3   :  { %452 = vmatpush3.bf16.msra.mxu0 %v499_v0  ;;  %491 = vmatpush3.bf16.msra.mxu1 %v499_v0  ;;  %v507_v4 = vld [vmem:[%s653_s0] sm:$0xff]   ;;  %v505_v8 = vld [vmem:[%s652_s1 + $0x8] sm:$0xff]   ;;  %v511_v12 = vld [vmem:[%s653_s0 + $0x10] sm:$0xff]  }
   0x4   :  { %453 = vmatprep.subr.bf16.mxu0 %v500_v1  ;;  %484 = vmatprep.subr.bf16.mxu1 %v500_v1  ;;  %v508_v5 = vld [vmem:[%s653_s0 + $0x20] sm:$0xff]   ;;  %v509_v10 = vld [vmem:[%s653_s0 + $0x8] sm:$0xff]   ;;  %v512_v13 = vld [vmem:[%s653_s0 + $0x30] sm:$0xff]  }
   0x5   :  { %467 = vmatprep.mubr.bf16.mxu0 %v507_v4  ;;  %475 = vmatprep.mubr.bf16.mxu1 %v508_v5  ;;  %v506_v9 = vld [vmem:[%s652_s1] sm:$0xff]   ;;  %v510_v11 = vld [vmem:[%s653_s0 + $0x28] sm:$0xff]   ;;  %v513_v14 = vld [vmem:[%s653_s0 + $0x18] sm:$0xff]  }
   0x6   :  { %v514_v15 = vld [vmem:[%s653_s0 + $0x38] sm:$0xff]   ;;  %v586_v16 = vld [vmem:[%s654_s2] ss:$0 sm:$0xff] }
   0x7   :  { %454 = vmatpush3.bf16.msra.mxu0 %v500_v1  ;;  %492 = vmatpush3.bf16.msra.mxu1 %v500_v1 }
   0x8   :  { %455 = vmatprep.subr.bf16.mxu0 %v501_v2  ;;  %485 = vmatprep.subr.bf16.mxu1 %v501_v2 }
   0xb   :  { %456 = vmatpush3.bf16.msra.mxu0 %v501_v2  ;;  %493 = vmatpush3.bf16.msra.mxu1 %v501_v2 }
   0xc   :  { %457 = vmatprep.subr.bf16.mxu0 %v502_v3  ;;  %486 = vmatprep.subr.bf16.mxu1 %v502_v3 }
   0xf   :  { %458 = vmatpush3.bf16.msra.mxu0 %v502_v3  ;;  %494 = vmatpush3.bf16.msra.mxu1 %v502_v3 }
  0x10   :  { %459 = vmatprep.subr.bf16.mxu0 %v503_v6  ;;  %487 = vmatprep.subr.bf16.mxu1 %v503_v6 }
  0x13   :  { %460 = vmatpush3.bf16.msra.mxu0 %v503_v6  ;;  %495 = vmatpush3.bf16.msra.mxu1 %v503_v6 }
  0x14   :  { %461 = vmatprep.subr.bf16.mxu0 %v504_v7  ;;  %488 = vmatprep.subr.bf16.mxu1 %v504_v7 }
  0x17   :  { %462 = vmatpush3.bf16.msra.mxu0 %v504_v7  ;;  %496 = vmatpush3.bf16.msra.mxu1 %v504_v7 }
  0x18   :  { %463 = vmatprep.subr.bf16.mxu0 %v505_v8  ;;  %489 = vmatprep.subr.bf16.mxu1 %v505_v8 }
  0x1b   :  { %464 = vmatpush3.bf16.msra.mxu0 %v505_v8  ;;  %497 = vmatpush3.bf16.msra.mxu1 %v505_v8 }
  0x1c   :  { %465 = vmatprep.subr.bf16.mxu0 %v506_v9  ;;  %490 = vmatprep.subr.bf16.mxu1 %v506_v9 }
  0x1f   :  { %466 = vmatpush3.bf16.msra.mxu0 %v506_v9  ;;  %498 = vmatpush3.bf16.msra.mxu1 %v506_v9 }
  0x22   :  { %468 = vmatmul.mubr.bf16.vlgmr.msra.gmra.mxu0 %v509_v10  ;;  %476 = vmatmul.mubr.bf16.vlgmr.msra.gmra.mxu1 %v510_v11 }
  0x23   :  { %471 = vmatprep.mubr.bf16.mxu0 %v511_v12  ;;  %479 = vmatprep.mubr.bf16.mxu1 %v512_v13 }
  0x2a   :  { %472 = vmatmul.mubr.bf16.gmra.mxu0 %v513_v14  ;;  %480 = vmatmul.mubr.bf16.gmra.mxu1 %v514_v15 }
  0xe2   :  { %v469_v17 = vpop.f32.mrf.mxu0  ;;  %v477_v18 = vpop.f32.mrf.mxu1 }
  0xe3   :  { %v336_v19 = vadd.f32 %v469_v17, %v586_v16  ;;  %v344_v20 = vadd.f32 %v477_v18, %v586_v16 }
  0xe4   :  { %v213_v21 = vpop.f32.mrf.mxu0  ;;  %v245_v22 = vpop.f32.mrf.mxu1 }
  0xe5   :  { %vm352_vm0 = vcmp.ge.f32.partialorder %v336_v19, 0.0  ;;  %v368_v23 = vmul.f32 0.02, %v336_v19  ;;  %vm360_vm1 = vcmp.ge.f32.partialorder %v344_v20, 0.0  ;;  %v376_v24 = vmul.f32 0.02, %v344_v20 }
  0xe6   :  { %v334_v25 = vadd.f32 %v586_v16, %v213_v21  ;;  %v342_v26 = vadd.f32 %v586_v16, %v245_v22  ;;  %v470_v27 = vpop.f32.mrf.mxu0  ;;  %v478_v28 = vpop.f32.mrf.mxu1 }
  0xe7   :  { %v384_v29 = vsel %vm352_vm0, %v336_v19, %v368_v23  ;;  %v392_v30 = vsel %vm360_vm1, %v344_v20, %v376_v24  ;;  %v337_v31 = vadd.f32 %v470_v27, %v586_v16  ;;  %v345_v32 = vadd.f32 %v478_v28, %v586_v16 }
  0xe8   :  { %400 = vst [vmem:[%s655_s3 + $0x10] sm:$0xff] %v384_v29  ;;  %408 = vst [vmem:[%s655_s3 + $0x50] sm:$0xff] %v392_v30  ;;  %vm350_vm2 = vcmp.ge.f32.partialorder %v334_v25, 0.0  ;;  %v366_v33 = vmul.f32 0.02, %v334_v25  ;;  %vm358_vm3 = vcmp.ge.f32.partialorder %v342_v26, 0.0  ;;  %v216_v35 = vpop.f32.mrf.mxu0  ;;  %v248_v36 = vpop.f32.mrf.mxu1 }
  0xe9   :  { %v374_v34 = vmul.f32 0.02, %v342_v26  ;;  %vm353_vm4 = vcmp.ge.f32.partialorder %v337_v31, 0.0  ;;  %v369_v37 = vmul.f32 0.02, %v337_v31  ;;  %vm361_vm5 = vcmp.ge.f32.partialorder %v345_v32, 0.0 }
  0xea   :  { %v377_v38 = vmul.f32 0.02, %v345_v32  ;;  %v382_v39 = vsel %vm350_vm2, %v334_v25, %v366_v33  ;;  %v335_v41 = vadd.f32 %v586_v16, %v216_v35  ;;  %v343_v42 = vadd.f32 %v586_v16, %v248_v36  ;;  %v473_v43 = vpop.f32.mrf.mxu0  ;;  %v481_v44 = vpop.f32.mrf.mxu1 }
  0xeb   :  { %v390_v40 = vsel %vm358_vm3, %v342_v26, %v374_v34  ;;  %398 = vst [vmem:[%s655_s3] sm:$0xff] %v382_v39  ;;  %v385_v45 = vsel %vm353_vm4, %v337_v31, %v369_v37  ;;  %v340_v47 = vadd.f32 %v473_v43, %v586_v16  ;;  %v348_v48 = vadd.f32 %v481_v44, %v586_v16 }
  0xec   :  { %406 = vst [vmem:[%s655_s3 + $0x40] sm:$0xff] %v390_v40  ;;  %v393_v46 = vsel %vm361_vm5, %v345_v32, %v377_v38  ;;  %401 = vst [vmem:[%s655_s3 + $0x18] sm:$0xff] %v385_v45  ;;  %vm351_vm6 = vcmp.ge.f32.partialorder %v335_v41, 0.0  ;;  %v367_v49 = vmul.f32 0.02, %v335_v41  ;;  %vm359_vm7 = vcmp.ge.f32.partialorder %v343_v42, 0.0  ;;  %v229_v51 = vpop.f32.mrf.mxu0  ;;  %v261_v52 = vpop.f32.mrf.mxu1 }
  0xed   :  { %409 = vst [vmem:[%s655_s3 + $0x58] sm:$0xff] %v393_v46  ;;  %v375_v50 = vmul.f32 0.02, %v343_v42  ;;  %vm356_vm8 = vcmp.ge.f32.partialorder %v340_v47, 0.0  ;;  %v372_v53 = vmul.f32 0.02, %v340_v47  ;;  %v338_v57 = vadd.f32 %v586_v16, %v229_v51 }
  0xee   :  { %vm364_vm9 = vcmp.ge.f32.partialorder %v348_v48, 0.0  ;;  %v380_v54 = vmul.f32 0.02, %v348_v48  ;;  %v383_v55 = vsel %vm351_vm6, %v335_v41, %v367_v49  ;;  %v346_v58 = vadd.f32 %v586_v16, %v261_v52  ;;  %v474_v59 = vpop.f32.mrf.mxu0  ;;  %v482_v60 = vpop.f32.mrf.mxu1 }
  0xef   :  { %v391_v56 = vsel %vm359_vm7, %v343_v42, %v375_v50  ;;  %399 = vst [vmem:[%s655_s3 + $0x8] sm:$0xff] %v383_v55  ;;  %v388_v61 = vsel %vm356_vm8, %v340_v47, %v372_v53  ;;  %v341_v63 = vadd.f32 %v474_v59, %v586_v16  ;;  %v349_v0 = vadd.f32 %v482_v60, %v586_v16 }
  0xf0   :  { %407 = vst [vmem:[%s655_s3 + $0x48] sm:$0xff] %v391_v56  ;;  %v396_v62 = vsel %vm364_vm9, %v348_v48, %v380_v54  ;;  %404 = vst [vmem:[%s655_s3 + $0x30] sm:$0xff] %v388_v61  ;;  %vm354_vm10 = vcmp.ge.f32.partialorder %v338_v57, 0.0  ;;  %v370_v1 = vmul.f32 0.02, %v338_v57  ;;  %vm362_vm11 = vcmp.ge.f32.partialorder %v346_v58, 0.0  ;;  %v232_v3 = vpop.f32.mrf.mxu0  ;;  %v264_v4 = vpop.f32.mrf.mxu1 }
  0xf1   :  { %412 = vst [vmem:[%s655_s3 + $0x70] sm:$0xff] %v396_v62  ;;  %v378_v2 = vmul.f32 0.02, %v346_v58  ;;  %vm357_vm12 = vcmp.ge.f32.partialorder %v341_v63, 0.0  ;;  %v373_v5 = vmul.f32 0.02, %v341_v63  ;;  %v339_v9 = vadd.f32 %v586_v16, %v232_v3 }
  0xf2   :  { %vm365_vm13 = vcmp.ge.f32.partialorder %v349_v0, 0.0  ;;  %v381_v6 = vmul.f32 0.02, %v349_v0  ;;  %v386_v7 = vsel %vm354_vm10, %v338_v57, %v370_v1  ;;  %v347_v10 = vadd.f32 %v586_v16, %v264_v4 }
  0xf3   :  { %v394_v8 = vsel %vm362_vm11, %v346_v58, %v378_v2  ;;  %402 = vst [vmem:[%s655_s3 + $0x20] sm:$0xff] %v386_v7  ;;  %v389_v11 = vsel %vm357_vm12, %v341_v63, %v373_v5  ;;  %vm355_vm14 = vcmp.ge.f32.partialorder %v339_v9, 0.0  ;;  %v371_v13 = vmul.f32 0.02, %v339_v9 }
  0xf4   :  { %410 = vst [vmem:[%s655_s3 + $0x60] sm:$0xff] %v394_v8  ;;  %v397_v12 = vsel %vm365_vm13, %v349_v0, %v381_v6  ;;  %405 = vst [vmem:[%s655_s3 + $0x38] sm:$0xff] %v389_v11  ;;  %vm363_vm15 = vcmp.ge.f32.partialorder %v347_v10, 0.0  ;;  %v379_v14 = vmul.f32 0.02, %v347_v10 }
  0xf5   :  { %413 = vst [vmem:[%s655_s3 + $0x78] sm:$0xff] %v397_v12  ;;  %v387_v15 = vsel %vm355_vm14, %v339_v9, %v371_v13 }
  0xf6   :  { %v395_v16 = vsel %vm363_vm15, %v347_v10, %v379_v14  ;;  %403 = vst [vmem:[%s655_s3 + $0x28] sm:$0xff] %v387_v15 }
  0xf7   :  { %411 = vst [vmem:[%s655_s3 + $0x68] sm:$0xff] %v395_v16 }

// kernel: disc_low_forward.5
= control target key start
LH: loop header
LB: loop body
LE: loop exit
PB: predicated region body
PF: predicated region fallthrough
CT: control target
= control target key end

     0   :  { %s805_s12 = smov 0   ;;  %s807_s13 = smov 0   ;;  %s907_s0 = inlined_call_operand.vmem [shape: bf16[16,128], index: 0, kind: input, shape index: {}]   ;;  %s908_s1 = inlined_call_operand.vmem [shape: bf16[128,512], index: 1, kind: input, shape index: {}]   ;;  %s909_s2 = inlined_call_operand.vmem [shape: f32[1,512], index: 2, kind: input, shape index: {}]   ;;  %s910_s3 = inlined_call_operand.vmem [shape: f32[16,512], index: 3, kind: output, shape index: {}]  }
   0x1   :  { %s809_s14 = smov 0   ;;  %s811_s15 = smov 0  }
   0x2   :  { %s813_s16 = smov 0  }
   0x3 LB: > { %s28_s17 = sadd.s32 1, %s777_s15  ;;  %s639_s18 = sadd.s32 4294967295, %s781_s16   ;;  %s781_s16 = sphi %s813_s16, %s13_s16   ;;  %s777_s15 = sphi %s811_s15, %s915_s15   ;;  %s773_s14 = sphi %s809_s14, %s914_s14   ;;  %s769_s13 = sphi %s807_s13, %s913_s13   ;;  %s765_s12 = sphi %s805_s12, %s912_s12  }
   0x4   : > { %p30_p0 = scmp.ge.s32.totalorder %s28_s17, 4  ;;  %p76_p1 = scmp.ne.s32.totalorder %s769_s13, %s765_s12 }
   0x5   : > { %p77_p2 = scmp.eq.s32.totalorder %s781_s16, 0  ;;  %p134_p4 = scmp.eq.s32.totalorder %s639_s18, 3 }
   0x6   : > { %s917_s17 = smov (%p30_p0, %s28_s17), 0  ;;  %s69_s20 = sadd.s32 1, %s769_s13 }
   0x7   : > { %p78_p3 = por %p77_p2, %p76_p1  ;;  %s65_s19 = ssub.s32 %s777_s15, %s917_s17 }
   0x8   : > { %p67_p5 = scmp.eq.s32.totalorder %s65_s19, 0  ;;  %p840_p6 = por %p134_p4, %p76_p1 }
   0x9   : > { %p643_p7 = scmp.ge.s32.totalorder %s781_s16, 4 }
   0xa   : > { %s845_s22 = scalar_select %p67_p5, %s769_s13, %s69_s20  }
   0xb   : > { %168 = sbr.rel (%p643_p7) target bundleno = 31 (0x1f), region = 20 }
  0x10   : > { %171 = sbr.rel (!%p78_p3) target bundleno = 31 (0x1f), region = 24  ;;  %s173_s23 = sand.u32 (%p78_p3), 1, %s769_s13  }
  0x11   : > { %s645_s24 = sshll.u32 (%p78_p3), %s777_s15, 2  ;;  %s644_s25 = sshll.u32 (%p78_p3), %s173_s23, 6 }
  0x12   : > { %s853_s28 = scalar_lea.vmem (%p78_p3), %s908_s1, %s645_s24  ;;  %s175_s29 = scalar_lea.vmem (%p78_p3), [#allocation3], %s644_s25 }
  0x13   : > { %v197_v0 = vld [vmem:[%s853_s28] sm:$0xf] (%p78_p3)  ;;  %v199_v1 = vld [vmem:[%s853_s28 + $0x10] sm:$0xf] (%p78_p3) }
  0x14   : > { %198 = vst [vmem:[%s175_s29] sm:$0xf] (%p78_p3), %v197_v0  ;;  %200 = vst [vmem:[%s175_s29 + $0x4] sm:$0xf] (%p78_p3), %v199_v1  ;;  %v201_v2 = vld [vmem:[%s853_s28 + $0x20] sm:$0xf] (%p78_p3) }
  0x15   : > { %v203_v3 = vld [vmem:[%s853_s28 + $0x30] sm:$0xf]  ;;  %v205_v4 = vld [vmem:[%s853_s28 + $0x40] sm:$0xf]  ;;  %202 = vst [vmem:[%s175_s29 + $0x8] sm:$0xf] %v201_v2 }
  0x16   : > { %204 = vst [vmem:[%s175_s29 + $0xc] sm:$0xf] %v203_v3  ;;  %206 = vst [vmem:[%s175_s29 + $0x10] sm:$0xf] %v205_v4  ;;  %v207_v5 = vld [vmem:[%s853_s28 + $0x50] sm:$0xf] }
  0x17   : > { %v209_v6 = vld [vmem:[%s853_s28 + $0x60] sm:$0xf]  ;;  %v211_v7 = vld [vmem:[%s853_s28 + $0x70] sm:$0xf]  ;;  %208 = vst [vmem:[%s175_s29 + $0x14] sm:$0xf] %v207_v5 }
  0x18   : > { %210 = vst [vmem:[%s175_s29 + $0x18] sm:$0xf] %v209_v6  ;;  %212 = vst [vmem:[%s175_s29 + $0x1c] sm:$0xf] %v211_v7  ;;  %v213_v8 = vld [vmem:[%s853_s28 + $0x80] sm:$0xf] }
  0x19   : > { %v215_v9 = vld [vmem:[%s853_s28 + $0x90] sm:$0xf]  ;;  %v217_v10 = vld [vmem:[%s853_s28 + $0xa0] sm:$0xf]  ;;  %214 = vst [vmem:[%s175_s29 + $0x20] sm:$0xf] %v213_v8 }
  0x1a   : > { %216 = vst [vmem:[%s175_s29 + $0x24] sm:$0xf] %v215_v9  ;;  %218 = vst [vmem:[%s175_s29 + $0x28] sm:$0xf] %v217_v10  ;;  %v219_v11 = vld [vmem:[%s853_s28 + $0xb0] sm:$0xf] }
  0x1b   : > { %v221_v12 = vld [vmem:[%s853_s28 + $0xc0] sm:$0xf]  ;;  %v223_v13 = vld [vmem:[%s853_s28 + $0xd0] sm:$0xf]  ;;  %220 = vst [vmem:[%s175_s29 + $0x2c] sm:$0xf] %v219_v11 }
  0x1c   : > { %222 = vst [vmem:[%s175_s29 + $0x30] sm:$0xf] %v221_v12  ;;  %224 = vst [vmem:[%s175_s29 + $0x34] sm:$0xf] %v223_v13  ;;  %v225_v14 = vld [vmem:[%s853_s28 + $0xe0] sm:$0xf] }
  0x1d   : > { %v227_v15 = vld [vmem:[%s853_s28 + $0xf0] sm:$0xf]  ;;  %226 = vst [vmem:[%s175_s29 + $0x38] sm:$0xf] %v225_v14 }
  0x1e   : > { %228 = vst [vmem:[%s175_s29 + $0x3c] sm:$0xf] %v227_v15 }
  0x1f PF: > { %p646_p8 = scmp.ge.s32.totalorder %s781_s16, 1  ;;  %p289_p9 = scmp.lt.s32.totalorder %s781_s16, 5 }
  0x21   : > { %p290_p10 = pnand %p646_p8, %p289_p9 }
  0x22   : > { %s296_s30 = sand.u32 (!%p290_p10), 1, %s765_s12   ;;  %p339_p11 = scmp.lt.s32.totalorder (!%p290_p10), %s773_s14, 3 }
  0x23   : > { %293 = sbr.rel (%p290_p10) target bundleno = 284 (0x11c), region = 69  ;;  %s647_s4 = sshll.u32 (!%p290_p10), %s296_s30, 6 }
  0x24   : > { %s298_s5 = scalar_lea.vmem (!%p290_p10), [#allocation3], %s647_s4  ;;  %s648_s18 = sshll.u32 (!%p290_p10), %s296_s30, 4 }
  0x25   : > { %s328_s19 = scalar_lea.vmem (!%p290_p10), [#allocation4], %s648_s18 }
  0x28   : > { %v783_v16 = vmov 0.0   ;;  %vm784_vm0 = vmmov 0   ;;  %v734_v17 = vld [vmem:[%s298_s5 + $0x38] sm:$0xff]   ;;  %v735_v18 = vld [vmem:[%s298_s5 + $0x30] sm:$0xff]   ;;  %v736_v19 = vld [vmem:[%s298_s5 + $0x28] sm:$0xff]   ;;  %s340_s8 = scalar_select %p339_p11, %s773_s14, 3 }
  0x29   : > { %672 = vmatprep.subr.bf16.mxu0 %v783_v16  ;;  %688 = vmatprep.mubr.msk.bf16.mxu0 %vm784_vm0, %v783_v16  ;;  %v737_v20 = vld [vmem:[%s298_s5 + $0x20] sm:$0xff]   ;;  %v738_v21 = vld [vmem:[%s298_s5 + $0x18] sm:$0xff]   ;;  %v739_v22 = vld [vmem:[%s298_s5 + $0x10] sm:$0xff]   ;;  %s660_s12 = sshll.u32 (%p840_p6), %s773_s14, 3 }
  0x2a   : > { %673 = vmatpush3.bf16.msra.mxu0 %v734_v17  ;;  %v740_v23 = vld [vmem:[%s298_s5 + $0x8] sm:$0xff]   ;;  %v741_v24 = vld [vmem:[%s298_s5] sm:$0xff]   ;;  %s341_s11 = scalar_lea.vmem %s909_s2, %s340_s8  ;;  %s502_s24 = scalar_lea.vmem (%p840_p6), %s910_s3, %s660_s12 }
  0x2b   : > { %674 = vmatprep.subr.bf16.mxu0 %v783_v16  ;;  %v742_v25 = vld [vmem:[%s907_s0] sm:$0xff]  }
  0x2c   : > { %v658_v26 = vld [vmem:[%s341_s11] ss:$0 sm:$0xff] }
  0x2e   : > { %675 = vmatpush3.bf16.msra.mxu0 %v735_v18 }
  0x2f   : > { %676 = vmatprep.subr.bf16.mxu0 %v783_v16 }
  0x32   : > { %677 = vmatpush3.bf16.msra.mxu0 %v736_v19 }
  0x33   : > { %678 = vmatprep.subr.bf16.mxu0 %v783_v16 }
  0x36   : > { %679 = vmatpush3.bf16.msra.mxu0 %v737_v20 }
  0x37   : > { %680 = vmatprep.subr.bf16.mxu0 %v783_v16 }
  0x3a   : > { %681 = vmatpush3.bf16.msra.mxu0 %v738_v21 }
  0x3b   : > { %682 = vmatprep.subr.bf16.mxu0 %v783_v16 }
  0x3e   : > { %683 = vmatpush3.bf16.msra.mxu0 %v739_v22 }
  0x3f   : > { %684 = vmatprep.subr.bf16.mxu0 %v783_v16 }
  0x42   : > { %685 = vmatpush3.bf16.msra.mxu0 %v740_v23 }
  0x43   : > { %686 = vmatprep.subr.bf16.mxu0 %v783_v16 }
  0x46   : > { %687 = vmatpush3.bf16.msra.mxu0 %v741_v24 }
  0x49   : > { %689 = vmatmul.mubr.bf16.vlgmr.msra.gmra.mxu0 %v742_v25 }
 0x109   : > { %v458_v27 = vpop.f32.mrf.mxu0 }
 0x10a   : > { %v481_v28 = vadd.f32 %v658_v26, %v458_v27 }
 0x10b   : > { %v690_v29 = vpop.f32.mrf.mxu0 }
 0x10c   : > { %vm483_vm1 = vcmp.ge.f32.partialorder %v481_v28, 0.0  ;;  %v485_v30 = vmul.f32 0.02, %v481_v28 }
 0x10d   : > { %v461_v31 = vpop.f32.mrf.mxu0 }
 0x10e   : > { %v487_v32 = vsel %vm483_vm1, %v481_v28, %v485_v30  ;;  %v482_v33 = vadd.f32 %v658_v26, %v461_v31 }
 0x10f   : > { %489 = vst [vmem:[%s328_s19] sm:$0xff] %v487_v32  ;;  %v691_v34 = vpop.f32.mrf.mxu0  ;;  %497 = sbr.rel (!%p840_p6) target bundleno = 284 (0x11c), region = 85 }
 0x110   : > { %vm484_vm2 = vcmp.ge.f32.partialorder %v482_v33, 0.0  ;;  %v486_v35 = vmul.f32 0.02, %v482_v33 }
 0x112   : > { %v488_v36 = vsel %vm484_vm2, %v482_v33, %v486_v35 }
 0x113   : > { %490 = vst [vmem:[%s328_s19 + $0x8] sm:$0xff] %v488_v36 }
 0x116   : > { %v533_v37 = vld [vmem:[%s328_s19] sm:$0xff] }
 0x117   : > { %534 = vst [vmem:[%s502_s24] sm:$0xff] %v533_v37 }
 0x11a   : > { %v535_v38 = vld [vmem:[%s328_s19 + $0x8] sm:$0xff] }
 0x11b   : > { %536 = vst [vmem:[%s502_s24 + $0x20] sm:$0xff] %v535_v38 }
 0x11c PF: > { %s13_s16 = sadd.s32 1, %s781_s16   ;;  %s912_s12 = smov %s769_s13 }
 0x11d   : > { %p10_p12 = scmp.ge.s32.totalorder %s13_s16, 6   ;;  %s913_s13 = smov %s845_s22 }
 0x11e   : > { %s914_s14 = smov %s777_s15  ;;  %s915_s15 = smov %s917_s17 }
 0x11f   :  { %12 = sbr.rel (!%p10_p12) target bundleno = 3 (0x3), region = 160 }

// kernel: disc_low_forward.6
= control target key start
LH: loop header
LB: loop body
LE: loop exit
PB: predicated region body
PF: predicated region fallthrough
CT: control target
= control target key end

     0   :  { %s1324_s12 = smov 0   ;;  %s1326_s13 = smov 0   ;;  %s1583_s0 = inlined_call_operand.vmem [shape: bf16[16,512], index: 0, kind: input, shape index: {}]   ;;  %s1584_s1 = inlined_call_operand.vmem [shape: bf16[512,4096], index: 1, kind: input, shape index: {}]   ;;  %s1585_s2 = inlined_call_operand.vmem [shape: f32[1,4096], index: 2, kind: input, shape index: {}]   ;;  %s1586_s3 = inlined_call_operand.vmem [shape: f32[16,4096], index: 3, kind: output, shape index: {}]  }
   0x1   :  { %s1328_s14 = smov 0   ;;  %s1330_s15 = smov 0  }
   0x2   :  { %s1332_s16 = smov 0  }
   0x3 LB: > { %s28_s17 = sadd.s32 1, %s1298_s15  ;;  %s1091_s18 = sadd.s32 4294967295, %s1302_s16   ;;  %s1302_s16 = sphi %s1332_s16, %s13_s16   ;;  %s1298_s15 = sphi %s1330_s15, %s1591_s15   ;;  %s1294_s14 = sphi %s1328_s14, %s1590_s14   ;;  %s1290_s13 = sphi %s1326_s13, %s1589_s13   ;;  %s1286_s12 = sphi %s1324_s12, %s1588_s12  }
   0x4   : > { %p30_p0 = scmp.ge.s32.totalorder %s28_s17, 32  ;;  %p76_p1 = scmp.ne.s32.totalorder %s1290_s13, %s1286_s12 }
   0x5   : > { %p77_p2 = scmp.eq.s32.totalorder %s1302_s16, 0  ;;  %p134_p4 = scmp.eq.s32.totalorder %s1091_s18, 31 }
   0x6   : > { %s1593_s17 = smov (%p30_p0, %s28_s17), 0  ;;  %s69_s20 = sadd.s32 1, %s1290_s13 }
   0x7   : > { %p78_p3 = por %p77_p2, %p76_p1  ;;  %s65_s19 = ssub.s32 %s1298_s15, %s1593_s17 }
   0x8   : > { %p67_p5 = scmp.eq.s32.totalorder %s65_s19, 0  ;;  %p1359_p6 = por %p134_p4, %p76_p1 }
   0x9   : > { %p1095_p7 = scmp.ge.s32.totalorder %s1302_s16, 32 }
   0xa   : > { %s1364_s22 = scalar_select %p67_p5, %s1290_s13, %s69_s20  }
   0xb   : > { %171 = sbr.rel (%p1095_p7) target bundleno = 84 (0x54), region = 20 }
  0x10   : > { %174 = sbr.rel (!%p78_p3) target bundleno = 84 (0x54), region = 24  ;;  %s176_s23 = sand.u32 (%p78_p3), 1, %s1290_s13  }
  0x11   : > { %s1097_s24 = sshll.u32 (%p78_p3), %s1298_s15, 2  ;;  %s1096_s25 = sshll.u32 (%p78_p3), %s176_s23, 8 }
  0x12   : > { %s1372_s28 = scalar_lea.vmem (%p78_p3), %s1584_s1, %s1097_s24  ;;  %s1376_s29 = scalar_lea.vmem (%p78_p3), [#allocation3], %s1096_s25 }
  0x13   : > { %v200_v0 = vld [vmem:[%s1372_s28] sm:$0xf] (%p78_p3) }
  0x14   : > { %v202_v1 = vld [vmem:[%s1372_s28 + $0x80] sm:$0xf] (%p78_p3)  ;;  %201 = vst [vmem:[%s1376_s29] sm:$0xf] (%p78_p3), %v200_v0 }
  0x15   : > { %203 = vst [vmem:[%s1376_s29 + $0x4] sm:$0xf] %v202_v1  ;;  %v204_v2 = vld [vmem:[%s1372_s28 + $0x100] sm:$0xf] }
  0x16   : > { %v206_v3 = vld [vmem:[%s1372_s28 + $0x180] sm:$0xf]  ;;  %205 = vst [vmem:[%s1376_s29 + $0x8] sm:$0xf] %v204_v2 }
  0x17   : > { %v208_v4 = vld [vmem:[%s1372_s28 + $0x200] sm:$0xf]  ;;  %207 = vst [vmem:[%s1376_s29 + $0xc] sm:$0xf] %v206_v3 }
  0x18   : > { %209 = vst [vmem:[%s1376_s29 + $0x10] sm:$0xf] %v208_v4  ;;  %v210_v5 = vld [vmem:[%s1372_s28 + $0x280] sm:$0xf] }
  0x19   : > { %v212_v6 = vld [vmem:[%s1372_s28 + $0x300] sm:$0xf]  ;;  %211 = vst [vmem:[%s1376_s29 + $0x14] sm:$0xf] %v210_v5 }
  0x1a   : > { %v214_v7 = vld [vmem:[%s1372_s28 + $0x380] sm:$0xf]  ;;  %213 = vst [vmem:[%s1376_s29 + $0x18] sm:$0xf] %v212_v6 }
  0x1b   : > { %215 = vst [vmem:[%s1376_s29 + $0x1c] sm:$0xf] %v214_v7  ;;  %v216_v8 = vld [vmem:[%s1372_s28 + $0x400] sm:$0xf] }
  0x1c   : > { %v218_v9 = vld [vmem:[%s1372_s28 + $0x480] sm:$0xf]  ;;  %217 = vst [vmem:[%s1376_s29 + $0x20] sm:$0xf] %v216_v8 }
  0x1d   : > { %v220_v10 = vld [vmem:[%s1372_s28 + $0x500] sm:$0xf]  ;;  %219 = vst [vmem:[%s1376_s29 + $0x24] sm:$0xf] %v218_v9 }
  0x1e   : > { %221 = vst [vmem:[%s1376_s29 + $0x28] sm:$0xf] %v220_v10  ;;  %v222_v11 = vld [vmem:[%s1372_s28 + $0x580] sm:$0xf] }
  0x1f   : > { %v224_v12 = vld [vmem:[%s1372_s28 + $0x600] sm:$0xf]  ;;  %223 = vst [vmem:[%s1376_s29 + $0x2c] sm:$0xf] %v222_v11 }
  0x20   : > { %v226_v13 = vld [vmem:[%s1372_s28 + $0x680] sm:$0xf]  ;;  %225 = vst [vmem:[%s1376_s29 + $0x30] sm:$0xf] %v224_v12 }
  0x21   : > { %227 = vst [vmem:[%s1376_s29 + $0x34] sm:$0xf] %v226_v13  ;;  %v228_v14 = vld [vmem:[%s1372_s28 + $0x700] sm:$0xf] }
  0x22   : > { %v230_v15 = vld [vmem:[%s1372_s28 + $0x780] sm:$0xf]  ;;  %229 = vst [vmem:[%s1376_s29 + $0x38] sm:$0xf] %v228_v14 }
  0x23   : > { %v232_v16 = vld [vmem:[%s1372_s28 + $0x800] sm:$0xf]  ;;  %231 = vst [vmem:[%s1376_s29 + $0x3c] sm:$0xf] %v230_v15 }
  0x24   : > { %233 = vst [vmem:[%s1376_s29 + $0x40] sm:$0xf] %v232_v16  ;;  %v234_v17 = vld [vmem:[%s1372_s28 + $0x880] sm:$0xf] }
  0x25   : > { %v236_v18 = vld [vmem:[%s1372_s28 + $0x900] sm:$0xf]  ;;  %235 = vst [vmem:[%s1376_s29 + $0x44] sm:$0xf] %v234_v17 }
  0x26   : > { %v238_v19 = vld [vmem:[%s1372_s28 + $0x980] sm:$0xf]  ;;  %237 = vst [vmem:[%s1376_s29 + $0x48] sm:$0xf] %v236_v18 }
  0x27   : > { %239 = vst [vmem:[%s1376_s29 + $0x4c] sm:$0xf] %v238_v19  ;;  %v240_v20 = vld [vmem:[%s1372_s28 + $0xa00] sm:$0xf] }
  0x28   : > { %v242_v21 = vld [vmem:[%s1372_s28 + $0xa80] sm:$0xf]  ;;  %241 = vst [vmem:[%s1376_s29 + $0x50] sm:$0xf] %v240_v20 }
  0x29   : > { %v244_v22 = vld [vmem:[%s1372_s28 + $0xb00] sm:$0xf]  ;;  %243 = vst [vmem:[%s1376_s29 + $0x54] sm:$0xf] %v242_v21 }
  0x2a   : > { %245 = vst [vmem:[%s1376_s29 + $0x58] sm:$0xf] %v244_v22  ;;  %v246_v23 = vld [vmem:[%s1372_s28 + $0xb80] sm:$0xf] }
  0x2b   : > { %v248_v24 = vld [vmem:[%s1372_s28 + $0xc00] sm:$0xf]  ;;  %247 = vst [vmem:[%s1376_s29 + $0x5c] sm:$0xf] %v246_v23 }
  0x2c   : > { %v250_v25 = vld [vmem:[%s1372_s28 + $0xc80] sm:$0xf]  ;;  %249 = vst [vmem:[%s1376_s29 + $0x60] sm:$0xf] %v248_v24 }
  0x2d   : > { %251 = vst [vmem:[%s1376_s29 + $0x64] sm:$0xf] %v250_v25  ;;  %v252_v26 = vld [vmem:[%s1372_s28 + $0xd00] sm:$0xf] }
  0x2e   : > { %v254_v27 = vld [vmem:[%s1372_s28 + $0xd80] sm:$0xf]  ;;  %253 = vst [vmem:[%s1376_s29 + $0x68] sm:$0xf] %v252_v26 }
  0x2f   : > { %v256_v28 = vld [vmem:[%s1372_s28 + $0xe00] sm:$0xf]  ;;  %255 = vst [vmem:[%s1376_s29 + $0x6c] sm:$0xf] %v254_v27 }
  0x30   : > { %257 = vst [vmem:[%s1376_s29 + $0x70] sm:$0xf] %v256_v28  ;;  %v258_v29 = vld [vmem:[%s1372_s28 + $0xe80] sm:$0xf] }
  0x31   : > { %v260_v30 = vld [vmem:[%s1372_s28 + $0xf00] sm:$0xf]  ;;  %259 = vst [vmem:[%s1376_s29 + $0x74] sm:$0xf] %v258_v29 }
  0x32   : > { %v262_v31 = vld [vmem:[%s1372_s28 + $0xf80] sm:$0xf]  ;;  %261 = vst [vmem:[%s1376_s29 + $0x78] sm:$0xf] %v260_v30 }
  0x33   : > { %263 = vst [vmem:[%s1376_s29 + $0x7c] sm:$0xf] %v262_v31  ;;  %v264_v32 = vld [vmem:[%s1372_s28 + $0x1000] sm:$0xf] }
  0x34   : > { %v266_v33 = vld [vmem:[%s1372_s28 + $0x1080] sm:$0xf]  ;;  %265 = vst [vmem:[%s1376_s29 + $0x80] sm:$0xf] %v264_v32 }
  0x35   : > { %v268_v34 = vld [vmem:[%s1372_s28 + $0x1100] sm:$0xf]  ;;  %267 = vst [vmem:[%s1376_s29 + $0x84] sm:$0xf] %v266_v33 }
  0x36   : > { %269 = vst [vmem:[%s1376_s29 + $0x88] sm:$0xf] %v268_v34  ;;  %v270_v35 = vld [vmem:[%s1372_s28 + $0x1180] sm:$0xf] }
  0x37   : > { %v272_v36 = vld [vmem:[%s1372_s28 + $0x1200] sm:$0xf]  ;;  %271 = vst [vmem:[%s1376_s29 + $0x8c] sm:$0xf] %v270_v35 }
  0x38   : > { %v274_v37 = vld [vmem:[%s1372_s28 + $0x1280] sm:$0xf]  ;;  %273 = vst [vmem:[%s1376_s29 + $0x90] sm:$0xf] %v272_v36 }
  0x39   : > { %275 = vst [vmem:[%s1376_s29 + $0x94] sm:$0xf] %v274_v37  ;;  %v276_v38 = vld [vmem:[%s1372_s28 + $0x1300] sm:$0xf] }
  0x3a   : > { %v278_v39 = vld [vmem:[%s1372_s28 + $0x1380] sm:$0xf]  ;;  %277 = vst [vmem:[%s1376_s29 + $0x98] sm:$0xf] %v276_v38 }
  0x3b   : > { %v280_v40 = vld [vmem:[%s1372_s28 + $0x1400] sm:$0xf]  ;;  %279 = vst [vmem:[%s1376_s29 + $0x9c] sm:$0xf] %v278_v39 }
  0x3c   : > { %281 = vst [vmem:[%s1376_s29 + $0xa0] sm:$0xf] %v280_v40  ;;  %v282_v41 = vld [vmem:[%s1372_s28 + $0x1480] sm:$0xf] }
  0x3d   : > { %v284_v42 = vld [vmem:[%s1372_s28 + $0x1500] sm:$0xf]  ;;  %283 = vst [vmem:[%s1376_s29 + $0xa4] sm:$0xf] %v282_v41 }
  0x3e   : > { %v286_v43 = vld [vmem:[%s1372_s28 + $0x1580] sm:$0xf]  ;;  %285 = vst [vmem:[%s1376_s29 + $0xa8] sm:$0xf] %v284_v42 }
  0x3f   : > { %287 = vst [vmem:[%s1376_s29 + $0xac] sm:$0xf] %v286_v43  ;;  %v288_v44 = vld [vmem:[%s1372_s28 + $0x1600] sm:$0xf] }
  0x40   : > { %v290_v45 = vld [vmem:[%s1372_s28 + $0x1680] sm:$0xf]  ;;  %289 = vst [vmem:[%s1376_s29 + $0xb0] sm:$0xf] %v288_v44 }
  0x41   : > { %v292_v46 = vld [vmem:[%s1372_s28 + $0x1700] sm:$0xf]  ;;  %291 = vst [vmem:[%s1376_s29 + $0xb4] sm:$0xf] %v290_v45 }
  0x42   : > { %293 = vst [vmem:[%s1376_s29 + $0xb8] sm:$0xf] %v292_v46  ;;  %v294_v47 = vld [vmem:[%s1372_s28 + $0x1780] sm:$0xf] }
  0x43   : > { %v296_v48 = vld [vmem:[%s1372_s28 + $0x1800] sm:$0xf]  ;;  %295 = vst [vmem:[%s1376_s29 + $0xbc] sm:$0xf] %v294_v47 }
  0x44   : > { %v298_v49 = vld [vmem:[%s1372_s28 + $0x1880] sm:$0xf]  ;;  %297 = vst [vmem:[%s1376_s29 + $0xc0] sm:$0xf] %v296_v48 }
  0x45   : > { %299 = vst [vmem:[%s1376_s29 + $0xc4] sm:$0xf] %v298_v49  ;;  %v300_v50 = vld [vmem:[%s1372_s28 + $0x1900] sm:$0xf] }
  0x46   : > { %v302_v51 = vld [vmem:[%s1372_s28 + $0x1980] sm:$0xf]  ;;  %301 = vst [vmem:[%s1376_s29 + $0xc8] sm:$0xf] %v300_v50 }
  0x47   : > { %v304_v52 = vld [vmem:[%s1372_s28 + $0x1a00] sm:$0xf]  ;;  %303 = vst [vmem:[%s1376_s29 + $0xcc] sm:$0xf] %v302_v51 }
  0x48   : > { %305 = vst [vmem:[%s1376_s29 + $0xd0] sm:$0xf] %v304_v52  ;;  %v306_v53 = vld [vmem:[%s1372_s28 + $0x1a80] sm:$0xf] }
  0x49   : > { %v308_v54 = vld [vmem:[%s1372_s28 + $0x1b00] sm:$0xf]  ;;  %307 = vst [vmem:[%s1376_s29 + $0xd4] sm:$0xf] %v306_v53 }
  0x4a   : > { %v310_v55 = vld [vmem:[%s1372_s28 + $0x1b80] sm:$0xf]  ;;  %309 = vst [vmem:[%s1376_s29 + $0xd8] sm:$0xf] %v308_v54 }
  0x4b   : > { %311 = vst [vmem:[%s1376_s29 + $0xdc] sm:$0xf] %v310_v55  ;;  %v312_v56 = vld [vmem:[%s1372_s28 + $0x1c00] sm:$0xf] }
  0x4c   : > { %v314_v57 = vld [vmem:[%s1372_s28 + $0x1c80] sm:$0xf]  ;;  %313 = vst [vmem:[%s1376_s29 + $0xe0] sm:$0xf] %v312_v56 }
  0x4d   : > { %v316_v58 = vld [vmem:[%s1372_s28 + $0x1d00] sm:$0xf]  ;;  %315 = vst [vmem:[%s1376_s29 + $0xe4] sm:$0xf] %v314_v57 }
  0x4e   : > { %317 = vst [vmem:[%s1376_s29 + $0xe8] sm:$0xf] %v316_v58  ;;  %v318_v59 = vld [vmem:[%s1372_s28 + $0x1d80] sm:$0xf] }
  0x4f   : > { %v320_v60 = vld [vmem:[%s1372_s28 + $0x1e00] sm:$0xf]  ;;  %319 = vst [vmem:[%s1376_s29 + $0xec] sm:$0xf] %v318_v59 }
  0x50   : > { %v322_v61 = vld [vmem:[%s1372_s28 + $0x1e80] sm:$0xf]  ;;  %321 = vst [vmem:[%s1376_s29 + $0xf0] sm:$0xf] %v320_v60 }
  0x51   : > { %323 = vst [vmem:[%s1376_s29 + $0xf4] sm:$0xf] %v322_v61  ;;  %v324_v62 = vld [vmem:[%s1372_s28 + $0x1f00] sm:$0xf] }
  0x52   : > { %v326_v63 = vld [vmem:[%s1372_s28 + $0x1f80] sm:$0xf]  ;;  %325 = vst [vmem:[%s1376_s29 + $0xf8] sm:$0xf] %v324_v62 }
  0x53   : > { %327 = vst [vmem:[%s1376_s29 + $0xfc] sm:$0xf] %v326_v63 }
  0x54 PF: > { %p1098_p8 = scmp.ge.s32.totalorder %s1302_s16, 1  ;;  %p484_p9 = scmp.lt.s32.totalorder %s1302_s16, 33 }
  0x56   : > { %p485_p10 = pnand %p1098_p8, %p484_p9 }
  0x57   : > { %s491_s30 = sand.u32 (!%p485_p10), 1, %s1286_s12   ;;  %p539_p11 = scmp.lt.s32.totalorder (!%p485_p10), %s1294_s14, 31 }
  0x58   : > { %488 = sbr.rel (%p485_p10) target bundleno = 346 (0x15a), region = 69  ;;  %s1099_s4 = sshll.u32 (!%p485_p10), %s491_s30, 8 }
  0x59   : > { %s1515_s9 = scalar_lea.vmem (!%p485_p10), [#allocation3], %s1099_s4  ;;  %s1100_s26 = sshll.u32 (!%p485_p10), %s491_s30, 4 }
  0x5a   : > { %s525_s27 = scalar_lea.vmem (!%p485_p10), [#allocation4], %s1100_s26 }
  0x5d   : > { %v1260_v0 = vld [vmem:[%s1583_s0 + $0x4] ss:$16 sps:$4 sm:$0xff]   ;;  %v1263_v1 = vld [vmem:[%s1583_s0 + $0xc] ss:$16 sps:$4 sm:$0xff]   ;;  %v1258_v32 = vld [vmem:[%s1583_s0] ss:$16 sps:$4 sm:$0xff]  }
  0x5e   : > { %v1226_v2 = vld [vmem:[%s1515_s9 + $0x78] sm:$0xff]   ;;  %864 = vmatprep.mubr.bf16.mxu0 %v1260_v0  ;;  %905 = vmatprep.mubr.bf16.mxu1 %v1263_v1  ;;  %v1230_v6 = vld [vmem:[%s1515_s9 + $0x70] sm:$0xff]   ;;  %v1234_v10 = vld [vmem:[%s1515_s9 + $0x68] sm:$0xff]   ;;  %s540_s20 = scalar_select %p539_p11, %s1294_s14, 31 }
  0x5f   : > { %v1227_v3 = vld [vmem:[%s1515_s9 + $0xf8] sm:$0xff]   ;;  %1142 = vmatprep.subr.bf16.mxu0 %v1226_v2  ;;  %v1231_v7 = vld [vmem:[%s1515_s9 + $0xf0] sm:$0xff]   ;;  %v1235_v11 = vld [vmem:[%s1515_s9 + $0xe8] sm:$0xff]   ;;  %s1139_s12 = sshll.u32 (%p1359_p6), %s1294_s14, 3 }
  0x60   : > { %v1228_v4 = vld [vmem:[%s1515_s9 + $0x38] sm:$0xff]   ;;  %1164 = vmatprep.subr.bf16.mxu1 %v1227_v3  ;;  %v1232_v8 = vld [vmem:[%s1515_s9 + $0x30] sm:$0xff]   ;;  %v1236_v12 = vld [vmem:[%s1515_s9 + $0x28] sm:$0xff]   ;;  %s541_s25 = scalar_lea.vmem %s1585_s2, %s540_s20  ;;  %s951_s30 = scalar_lea.vmem (%p1359_p6), %s1586_s3, %s1139_s12 }
  0x61   : > { %v1229_v5 = vld [vmem:[%s1515_s9 + $0xb8] sm:$0xff]   ;;  %1143 = vmatpush3.bf16.msra.mxu0 %v1228_v4  ;;  %v1233_v9 = vld [vmem:[%s1515_s9 + $0xb0] sm:$0xff]   ;;  %v1237_v13 = vld [vmem:[%s1515_s9 + $0xa8] sm:$0xff]  }
  0x62   : > { %1165 = vmatpush3.bf16.msra.mxu1 %v1229_v5  ;;  %1144 = vmatprep.subr.bf16.mxu0 %v1230_v6  ;;  %v1238_v14 = vld [vmem:[%s1515_s9 + $0x60] sm:$0xff]   ;;  %v1242_v18 = vld [vmem:[%s1515_s9 + $0x58] sm:$0xff]   ;;  %v1246_v22 = vld [vmem:[%s1515_s9 + $0x50] sm:$0xff]  }
  0x63   : > { %1166 = vmatprep.subr.bf16.mxu1 %v1231_v7  ;;  %v1239_v15 = vld [vmem:[%s1515_s9 + $0xe0] sm:$0xff]   ;;  %v1243_v19 = vld [vmem:[%s1515_s9 + $0xd8] sm:$0xff]   ;;  %v1247_v23 = vld [vmem:[%s1515_s9 + $0xd0] sm:$0xff]  }
  0x64   : > { %v1240_v16 = vld [vmem:[%s1515_s9 + $0x20] sm:$0xff]   ;;  %v1244_v20 = vld [vmem:[%s1515_s9 + $0x18] sm:$0xff]   ;;  %v1248_v24 = vld [vmem:[%s1515_s9 + $0x10] sm:$0xff]  }
  0x65   : > { %1145 = vmatpush3.bf16.msra.mxu0 %v1232_v8  ;;  %v1241_v17 = vld [vmem:[%s1515_s9 + $0xa0] sm:$0xff]   ;;  %v1245_v21 = vld [vmem:[%s1515_s9 + $0x98] sm:$0xff]   ;;  %v1249_v25 = vld [vmem:[%s1515_s9 + $0x90] sm:$0xff]  }
  0x66   : > { %1167 = vmatpush3.bf16.msra.mxu1 %v1233_v9  ;;  %1146 = vmatprep.subr.bf16.mxu0 %v1234_v10  ;;  %v1250_v26 = vld [vmem:[%s1515_s9 + $0x48] sm:$0xff]   ;;  %v1254_v30 = vld [vmem:[%s1515_s9 + $0x40] sm:$0xff]  }
  0x67   : > { %1168 = vmatprep.subr.bf16.mxu1 %v1235_v11  ;;  %v1251_v27 = vld [vmem:[%s1515_s9 + $0xc8] sm:$0xff]   ;;  %v1255_v31 = vld [vmem:[%s1515_s9 + $0xc0] sm:$0xff]  }
  0x68   : > { %v1252_v28 = vld [vmem:[%s1515_s9 + $0x8] sm:$0xff]   ;;  %v1256_v33 = vld [vmem:[%s1515_s9] sm:$0xff]  }
  0x69   : > { %1147 = vmatpush3.bf16.msra.mxu0 %v1236_v12  ;;  %v1253_v29 = vld [vmem:[%s1515_s9 + $0x88] sm:$0xff]   ;;  %v1257_v34 = vld [vmem:[%s1515_s9 + $0x80] sm:$0xff]  }
  0x6a   : > { %1169 = vmatpush3.bf16.msra.mxu1 %v1237_v13  ;;  %1148 = vmatprep.subr.bf16.mxu0 %v1238_v14  ;;  %v1261_v35 = vld [vmem:[%s1583_s0 + $0x8] ss:$16 sps:$4 sm:$0xff]   ;;  %v1137_v43 = vld [vmem:[%s541_s25] ss:$0 sm:$0xff] }
  0x6b   : > { %1170 = vmatprep.subr.bf16.mxu1 %v1239_v15 }
  0x6d   : > { %1149 = vmatpush3.bf16.msra.mxu0 %v1240_v16 }
  0x6e   : > { %1171 = vmatpush3.bf16.msra.mxu1 %v1241_v17  ;;  %1150 = vmatprep.subr.bf16.mxu0 %v1242_v18 }
  0x6f   : > { %1172 = vmatprep.subr.bf16.mxu1 %v1243_v19 }
  0x71   : > { %1151 = vmatpush3.bf16.msra.mxu0 %v1244_v20 }
  0x72   : > { %1173 = vmatpush3.bf16.msra.mxu1 %v1245_v21  ;;  %1152 = vmatprep.subr.bf16.mxu0 %v1246_v22 }
  0x73   : > { %1174 = vmatprep.subr.bf16.mxu1 %v1247_v23 }
  0x75   : > { %1153 = vmatpush3.bf16.msra.mxu0 %v1248_v24 }
  0x76   : > { %1175 = vmatpush3.bf16.msra.mxu1 %v1249_v25  ;;  %1154 = vmatprep.subr.bf16.mxu0 %v1250_v26 }
  0x77   : > { %1176 = vmatprep.subr.bf16.mxu1 %v1251_v27 }
  0x79   : > { %1155 = vmatpush3.bf16.msra.mxu0 %v1252_v28 }
  0x7a   : > { %1177 = vmatpush3.bf16.msra.mxu1 %v1253_v29  ;;  %1156 = vmatprep.subr.bf16.mxu0 %v1254_v30 }
  0x7b   : > { %1178 = vmatprep.subr.bf16.mxu1 %v1255_v31 }
  0x7d   : > { %1157 = vmatpush3.bf16.msra.mxu0 %v1256_v33 }
  0x7e   : > { %1179 = vmatpush3.bf16.msra.mxu1 %v1257_v34 }
  0x80   : > { %865 = vmatmul.mubr.bf16.vlgmr.msra.gmra.mxu0 %v1258_v32 }
  0x81   : > { %906 = vmatmul.mubr.bf16.vlgmr.msra.gmra.mxu1 %v1261_v35 }
 0x140   : > { %v1158_v36 = vpop.f32.mrf.mxu0 }
 0x141   : > { %v1180_v37 = vpop.f32.mrf.mxu1 }
 0x142   : > { %v1159_v38 = vpop.f32.mrf.mxu0 }
 0x143   : > { %v1160_v39 = vadd.f32 %v1159_v38, %v1158_v36  ;;  %v1181_v40 = vpop.f32.mrf.mxu1 }
 0x144   : > { %v1182_v41 = vadd.f32 %v1181_v40, %v1180_v37  ;;  %v1161_v42 = vpop.f32.mrf.mxu0 }
 0x145   : > { %v1183_v44 = vpop.f32.mrf.mxu1 }
 0x146   : > { %v908_v45 = vadd.f32 %v1182_v41, %v1160_v39  ;;  %v1162_v46 = vpop.f32.mrf.mxu0 }
 0x147   : > { %v1163_v47 = vadd.f32 %v1162_v46, %v1161_v42  ;;  %v1184_v48 = vpop.f32.mrf.mxu1 }
 0x148   : > { %v930_v49 = vadd.f32 %v1137_v43, %v908_v45  ;;  %v1185_v50 = vadd.f32 %v1184_v48, %v1183_v44 }
 0x14a   : > { %vm932_vm0 = vcmp.ge.f32.partialorder %v930_v49, 0.0  ;;  %v934_v51 = vmul.f32 0.02, %v930_v49  ;;  %v911_v52 = vadd.f32 %v1185_v50, %v1163_v47 }
 0x14c   : > { %v936_v53 = vsel %vm932_vm0, %v930_v49, %v934_v51  ;;  %v931_v54 = vadd.f32 %v1137_v43, %v911_v52 }
 0x14d   : > { %938 = vst [vmem:[%s525_s27] sm:$0xff] %v936_v53  ;;  %946 = sbr.rel (!%p1359_p6) target bundleno = 346 (0x15a), region = 85 }
 0x14e   : > { %vm933_vm1 = vcmp.ge.f32.partialorder %v931_v54, 0.0  ;;  %v935_v55 = vmul.f32 0.02, %v931_v54 }
 0x150   : > { %v937_v56 = vsel %vm933_vm1, %v931_v54, %v935_v55 }
 0x151   : > { %939 = vst [vmem:[%s525_s27 + $0x8] sm:$0xff] %v937_v56 }
 0x154   : > { %v982_v57 = vld [vmem:[%s525_s27] sm:$0xff] }
 0x155   : > { %983 = vst [vmem:[%s951_s30] sm:$0xff] %v982_v57 }
 0x158   : > { %v984_v58 = vld [vmem:[%s525_s27 + $0x8] sm:$0xff] }
 0x159   : > { %985 = vst [vmem:[%s951_s30 + $0x100] sm:$0xff] %v984_v58 }
 0x15a PF: > { %s13_s16 = sadd.s32 1, %s1302_s16   ;;  %s1588_s12 = smov %s1290_s13 }
 0x15b   : > { %p10_p12 = scmp.ge.s32.totalorder %s13_s16, 34   ;;  %s1589_s13 = smov %s1364_s22 }
 0x15c   : > { %s1590_s14 = smov %s1298_s15  ;;  %s1591_s15 = smov %s1593_s17 }
 0x15d   :  { %12 = sbr.rel (!%p10_p12) target bundleno = 3 (0x3), region = 160 }

// kernel: disc_low_forward.8
= control target key start
LH: loop header
LB: loop body
LE: loop exit
PB: predicated region body
PF: predicated region fallthrough
CT: control target
= control target key end

     0   :  { %s2376_s0 = inlined_call_operand.vmem [shape: bf16[32,3200], index: 0, kind: input, shape index: {}]   ;;  %s2377_s1 = inlined_call_operand.vmem [shape: bf16[3200,256], index: 1, kind: input, shape index: {}]   ;;  %s2378_s2 = inlined_call_operand.vmem [shape: f32[1,256], index: 2, kind: input, shape index: {}]   ;;  %s2379_s3 = inlined_call_operand.vmem [shape: f32[32,256], index: 3, kind: input, shape index: {}]   ;;  %s2380_s4 = inlined_call_operand.vmem [shape: f32[32,256], index: 4, kind: output, shape index: {}]  }
   0x1   :  { %2383 = sst [smem:[#allocation9_spill]] %s2376_s0 }
   0x2   :  { %2384 = sst [smem:[#allocation10_spill]] %s2377_s1 }
   0x3   :  { %s1952_s15 = smov 0   ;;  %s1954_s16 = smov 0  }
   0x4   :  { %s1956_s17 = smov 0   ;;  %s1958_s18 = smov 0  }
   0x5   :  { %s1960_s19 = smov 0   ;;  %s1962_s20 = smov 0  }
   0x6   :  { %s1964_s21 = smov 0   ;;  %s1966_s22 = smov 0  }
   0x7   :  { %s1968_s23 = smov 0   ;;  %s1970_s24 = smov 0  }
   0x8   :  { %s1972_s25 = smov 0  }
   0x9 LB: > { %s1526_s26 = sadd.s32 4294967295, %s1924_s25   ;;  %s26_s27 = sadd.s32 1, %s1916_s23  ;;  %s1924_s25 = sphi %s1972_s25, %s14_s25   ;;  %s1920_s24 = sphi %s1970_s24, %s2404_s24   ;;  %s1916_s23 = sphi %s1968_s23, %s2403_s23   ;;  %s1912_s22 = sphi %s1966_s22, %s2402_s22   ;;  %s1908_s21 = sphi %s1964_s21, %s2401_s21   ;;  %s1904_s20 = sphi %s1962_s20, %s2400_s20   ;;  %s1900_s19 = sphi %s1960_s19, %s2399_s19   ;;  %s1896_s18 = sphi %s1958_s18, %s2398_s18   ;;  %s1892_s17 = sphi %s1956_s17, %s2397_s17   ;;  %s1888_s16 = sphi %s1954_s16, %s2396_s16   ;;  %s1884_s15 = sphi %s1952_s15, %s2395_s15  }
   0xa   : > { %p27_p0 = scmp.ge.s32.totalorder %s26_s27, 5  ;;  %s29_s28 = sadd.s32 1, %s1920_s24 }
   0xb   : > { %s42_s29 = sadd.s32 1, %s1904_s20  ;;  %p49_p1 = scmp.ne.s32.totalorder %s1904_s20, %s1900_s19 }
   0xc   : > { %s2406_s27 = smov (%p27_p0, %s26_s27), 0  ;;  %s2408_s28 = smov (!%p27_p0, %s29_s28), %s1920_s24 }
   0xd   : > { %2385 = sst [smem:[#allocation7_spill]] %s2406_s27  ;;  %s38_s30 = ssub.s32 %s1916_s23, %s2406_s27 }
   0xe   : > { %p50_p2 = scmp.eq.s32.totalorder %s1924_s25, 0  ;;  %p31_p3 = scmp.ge.s32.totalorder %s2408_s28, 2 }
   0xf   : > { %p40_p4 = scmp.eq.s32.totalorder %s38_s30, 0  ;;  %s70_s6 = sadd.s32 1, %s1896_s18 }
  0x10   : > { %p2021_p5 = por %p50_p2, %p49_p1  ;;  %s2410_s28 = smov (%p31_p3, %s2408_s28), 0 }
  0x11   : > { %2387 = sst [smem:[#allocation8_spill]] %s2410_s28  ;;  %s66_s8 = ssub.s32 %s1920_s24, %s2410_s28 }
  0x12   : > { %s2029_s7 = scalar_select %p40_p4, %s1904_s20, %s42_s29  }
  0x13   : > { %p77_p6 = scmp.ne.s32.totalorder %s1896_s18, %s1892_s17  ;;  %s67_s9 = sor.u32 %s66_s8, %s38_s30 }
  0x14   : > { %p122_p7 = scmp.eq.s32.totalorder %s66_s8, 0  ;;  %p68_p8 = scmp.eq.s32.totalorder %s67_s9, 0 }
  0x15   : > { %p2037_p9 = por %p77_p6, %p50_p2  ;;  %s124_s11 = sadd.s32 1, %s1888_s16 }
  0x16   : > { %p131_p10 = scmp.ne.s32.totalorder %s1888_s16, %s1884_s15  ;;  %p163_p12 = scmp.eq.s32.totalorder %s1526_s26, 9 }
  0x17   : > { %s2045_s12 = scalar_select %p68_p8, %s1896_s18, %s70_s6  }
  0x18   : > { %s2048_s13 = scalar_select %p122_p7, %s1888_s16, %s124_s11  }
  0x19   : > { %p2052_p11 = por %p131_p10, %p50_p2  ;;  %p2056_p13 = por %p163_p12, %p131_p10 }
  0x1a   : > { %p1529_p0 = scmp.ge.s32.totalorder %s1924_s25, 10 }
  0x1c   : > { %185 = sbr.rel (%p1529_p0) target bundleno = 116 (0x74), region = 16 }
  0x21   : > { %188 = sbr.rel (!%p2021_p5) target bundleno = 48 (0x30), region = 20  ;;  %s190_s30 = sand.u32 (%p2021_p5), 1, %s1904_s20  }
  0x22   : > { %s1603_s6 = smul.u32 (%p2021_p5), 20, %s1916_s23  ;;  %s2391_s0 = sld [smem:[#allocation9_spill]] (%p2021_p5) }
  0x23   : > { %s1691_s8 = smul.u32 (%p2021_p5), 80, %s190_s30 }
  0x25   : > { %s192_s26 = scalar_lea.vmem (%p2021_p5), [#allocation3], %s1691_s8 }
  0x28   : > { %s198_s28 = scalar_lea.vmem %s2391_s0, %s1603_s6 }
  0x29   : > { %v213_v0 = vld [vmem:[%s198_s28] sm:$0xff]  ;;  %v215_v1 = vld [vmem:[%s198_s28 + $0x8] sm:$0xff]  ;;  %v223_v5 = vld [vmem:[%s198_s28 + $0xd0] sm:$0xff] }
  0x2a   : > { %v217_v2 = vld [vmem:[%s198_s28 + $0x64] sm:$0xff]  ;;  %214 = vst [vmem:[%s192_s26] sm:$0xff] %v213_v0  ;;  %216 = vst [vmem:[%s192_s26 + $0x8] sm:$0xff] %v215_v1  ;;  %v219_v3 = vld [vmem:[%s198_s28 + $0x6c] sm:$0xff] }
  0x2b   : > { %218 = vst [vmem:[%s192_s26 + $0x14] sm:$0xff] %v217_v2  ;;  %v221_v4 = vld [vmem:[%s198_s28 + $0xc8] sm:$0xff]  ;;  %220 = vst [vmem:[%s192_s26 + $0x1c] sm:$0xff] %v219_v3  ;;  %v227_v7 = vld [vmem:[%s198_s28 + $0x134] sm:$0xff] }
  0x2c   : > { %222 = vst [vmem:[%s192_s26 + $0x28] sm:$0xff] %v221_v4  ;;  %224 = vst [vmem:[%s192_s26 + $0x30] sm:$0xff] %v223_v5  ;;  %v225_v6 = vld [vmem:[%s198_s28 + $0x12c] sm:$0xff]  ;;  %v1533_v9 = vld [vmem:[%s198_s28 + $0x74] sm:$0xf] }
  0x2d   : > { %v1531_v8 = vld [vmem:[%s198_s28 + $0x10] sm:$0xf]  ;;  %226 = vst [vmem:[%s192_s26 + $0x3c] sm:$0xff] %v225_v6  ;;  %228 = vst [vmem:[%s192_s26 + $0x44] sm:$0xff] %v227_v7  ;;  %v1535_v10 = vld [vmem:[%s198_s28 + $0xd8] sm:$0xf] }
  0x2e   : > { %1532 = vst [vmem:[%s192_s26 + $0x10] sm:$0xf] %v1531_v8  ;;  %v1537_v11 = vld [vmem:[%s198_s28 + $0x13c] sm:$0xf]  ;;  %1534 = vst [vmem:[%s192_s26 + $0x24] sm:$0xf] %v1533_v9 }
  0x2f   : > { %1536 = vst [vmem:[%s192_s26 + $0x38] sm:$0xf] %v1535_v10  ;;  %1538 = vst [vmem:[%s192_s26 + $0x4c] sm:$0xf] %v1537_v11 }
  0x30 PF: > { %250 = sbr.rel (!%p2037_p9) target bundleno = 110 (0x6e), region = 46  ;;  %s252_s5 = sand.u32 (%p2037_p9), 1, %s1896_s18  }
  0x31   : > { %s1604_s30 = smul.u32 (%p2037_p9), 160, %s1916_s23  ;;  %s2392_s1 = sld [smem:[#allocation10_spill]] (%p2037_p9) }
  0x32   : > { %s1692_s6 = smul.u32 (%p2037_p9), 320, %s252_s5 }
  0x33   : > { %s257_s8 = sadd.s32 (%p2037_p9), %s1920_s24, %s1604_s30 }
  0x34   : > { %s1540_s9 = sshll.u32 (%p2037_p9), %s257_s8, 2  ;;  %s2081_s28 = scalar_lea.vmem (%p2037_p9), [#allocation4], %s1692_s6 }
  0x37   : > { %s2076_s27 = scalar_lea.vmem %s2392_s1, %s1540_s9 }
  0x38   : > { %v276_v12 = vld [vmem:[%s2076_s27] sm:$0xf]  ;;  %v278_v13 = vld [vmem:[%s2076_s27 + $0x8] sm:$0xf]  ;;  %v280_v14 = vld [vmem:[%s2076_s27 + $0x10] sm:$0xf] }
  0x39   : > { %277 = vst [vmem:[%s2081_s28] sm:$0xf] %v276_v12  ;;  %279 = vst [vmem:[%s2081_s28 + $0x4] sm:$0xf] %v278_v13  ;;  %v282_v15 = vld [vmem:[%s2076_s27 + $0x18] sm:$0xf] }
  0x3a   : > { %281 = vst [vmem:[%s2081_s28 + $0x8] sm:$0xf] %v280_v14  ;;  %v284_v16 = vld [vmem:[%s2076_s27 + $0x20] sm:$0xf]  ;;  %v286_v17 = vld [vmem:[%s2076_s27 + $0x28] sm:$0xf] }
  0x3b   : > { %283 = vst [vmem:[%s2081_s28 + $0xc] sm:$0xf] %v282_v15  ;;  %285 = vst [vmem:[%s2081_s28 + $0x10] sm:$0xf] %v284_v16  ;;  %v288_v18 = vld [vmem:[%s2076_s27 + $0x30] sm:$0xf] }
  0x3c   : > { %287 = vst [vmem:[%s2081_s28 + $0x14] sm:$0xf] %v286_v17  ;;  %v290_v19 = vld [vmem:[%s2076_s27 + $0x38] sm:$0xf]  ;;  %v292_v20 = vld [vmem:[%s2076_s27 + $0x40] sm:$0xf] }
  0x3d   : > { %289 = vst [vmem:[%s2081_s28 + $0x18] sm:$0xf] %v288_v18  ;;  %291 = vst [vmem:[%s2081_s28 + $0x1c] sm:$0xf] %v290_v19  ;;  %v294_v21 = vld [vmem:[%s2076_s27 + $0x48] sm:$0xf] }
  0x3e   : > { %293 = vst [vmem:[%s2081_s28 + $0x20] sm:$0xf] %v292_v20  ;;  %v296_v22 = vld [vmem:[%s2076_s27 + $0x50] sm:$0xf]  ;;  %v298_v23 = vld [vmem:[%s2076_s27 + $0x58] sm:$0xf] }
  0x3f   : > { %295 = vst [vmem:[%s2081_s28 + $0x24] sm:$0xf] %v294_v21  ;;  %297 = vst [vmem:[%s2081_s28 + $0x28] sm:$0xf] %v296_v22  ;;  %v300_v24 = vld [vmem:[%s2076_s27 + $0x60] sm:$0xf] }
  0x40   : > { %299 = vst [vmem:[%s2081_s28 + $0x2c] sm:$0xf] %v298_v23  ;;  %v302_v25 = vld [vmem:[%s2076_s27 + $0x68] sm:$0xf]  ;;  %v304_v26 = vld [vmem:[%s2076_s27 + $0x70] sm:$0xf] }
  0x41   : > { %301 = vst [vmem:[%s2081_s28 + $0x30] sm:$0xf] %v300_v24  ;;  %303 = vst [vmem:[%s2081_s28 + $0x34] sm:$0xf] %v302_v25  ;;  %v306_v27 = vld [vmem:[%s2076_s27 + $0x78] sm:$0xf] }
  0x42   : > { %305 = vst [vmem:[%s2081_s28 + $0x38] sm:$0xf] %v304_v26  ;;  %v308_v28 = vld [vmem:[%s2076_s27 + $0x80] sm:$0xf]  ;;  %v310_v29 = vld [vmem:[%s2076_s27 + $0x88] sm:$0xf] }
  0x43   : > { %307 = vst [vmem:[%s2081_s28 + $0x3c] sm:$0xf] %v306_v27  ;;  %309 = vst [vmem:[%s2081_s28 + $0x40] sm:$0xf] %v308_v28  ;;  %v312_v30 = vld [vmem:[%s2076_s27 + $0x90] sm:$0xf] }
  0x44   : > { %311 = vst [vmem:[%s2081_s28 + $0x44] sm:$0xf] %v310_v29  ;;  %v314_v31 = vld [vmem:[%s2076_s27 + $0x98] sm:$0xf]  ;;  %v316_v32 = vld [vmem:[%s2076_s27 + $0xa0] sm:$0xf] }
  0x45   : > { %313 = vst [vmem:[%s2081_s28 + $0x48] sm:$0xf] %v312_v30  ;;  %315 = vst [vmem:[%s2081_s28 + $0x4c] sm:$0xf] %v314_v31  ;;  %v318_v33 = vld [vmem:[%s2076_s27 + $0xa8] sm:$0xf] }
  0x46   : > { %317 = vst [vmem:[%s2081_s28 + $0x50] sm:$0xf] %v316_v32  ;;  %v320_v34 = vld [vmem:[%s2076_s27 + $0xb0] sm:$0xf]  ;;  %v322_v35 = vld [vmem:[%s2076_s27 + $0xb8] sm:$0xf] }
  0x47   : > { %319 = vst [vmem:[%s2081_s28 + $0x54] sm:$0xf] %v318_v33  ;;  %321 = vst [vmem:[%s2081_s28 + $0x58] sm:$0xf] %v320_v34  ;;  %v324_v36 = vld [vmem:[%s2076_s27 + $0xc0] sm:$0xf] }
  0x48   : > { %323 = vst [vmem:[%s2081_s28 + $0x5c] sm:$0xf] %v322_v35  ;;  %v326_v37 = vld [vmem:[%s2076_s27 + $0xc8] sm:$0xf]  ;;  %v328_v38 = vld [vmem:[%s2076_s27 + $0xd0] sm:$0xf] }
  0x49   : > { %325 = vst [vmem:[%s2081_s28 + $0x60] sm:$0xf] %v324_v36  ;;  %327 = vst [vmem:[%s2081_s28 + $0x64] sm:$0xf] %v326_v37  ;;  %v330_v39 = vld [vmem:[%s2076_s27 + $0xd8] sm:$0xf] }
  0x4a   : > { %329 = vst [vmem:[%s2081_s28 + $0x68] sm:$0xf] %v328_v38  ;;  %v332_v40 = vld [vmem:[%s2076_s27 + $0xe0] sm:$0xf]  ;;  %v334_v41 = vld [vmem:[%s2076_s27 + $0xe8] sm:$0xf] }
  0x4b   : > { %331 = vst [vmem:[%s2081_s28 + $0x6c] sm:$0xf] %v330_v39  ;;  %333 = vst [vmem:[%s2081_s28 + $0x70] sm:$0xf] %v332_v40  ;;  %v336_v42 = vld [vmem:[%s2076_s27 + $0xf0] sm:$0xf] }
  0x4c   : > { %335 = vst [vmem:[%s2081_s28 + $0x74] sm:$0xf] %v334_v41  ;;  %v338_v43 = vld [vmem:[%s2076_s27 + $0xf8] sm:$0xf]  ;;  %v340_v44 = vld [vmem:[%s2076_s27 + $0x100] sm:$0xf] }
  0x4d   : > { %337 = vst [vmem:[%s2081_s28 + $0x78] sm:$0xf] %v336_v42  ;;  %339 = vst [vmem:[%s2081_s28 + $0x7c] sm:$0xf] %v338_v43  ;;  %v342_v45 = vld [vmem:[%s2076_s27 + $0x108] sm:$0xf] }
  0x4e   : > { %341 = vst [vmem:[%s2081_s28 + $0x80] sm:$0xf] %v340_v44  ;;  %v344_v46 = vld [vmem:[%s2076_s27 + $0x110] sm:$0xf]  ;;  %v346_v47 = vld [vmem:[%s2076_s27 + $0x118] sm:$0xf] }
  0x4f   : > { %343 = vst [vmem:[%s2081_s28 + $0x84] sm:$0xf] %v342_v45  ;;  %345 = vst [vmem:[%s2081_s28 + $0x88] sm:$0xf] %v344_v46  ;;  %v348_v48 = vld [vmem:[%s2076_s27 + $0x120] sm:$0xf] }
  0x50   : > { %347 = vst [vmem:[%s2081_s28 + $0x8c] sm:$0xf] %v346_v47  ;;  %v350_v49 = vld [vmem:[%s2076_s27 + $0x128] sm:$0xf]  ;;  %v352_v50 = vld [vmem:[%s2076_s27 + $0x130] sm:$0xf] }
  0x51   : > { %349 = vst [vmem:[%s2081_s28 + $0x90] sm:$0xf] %v348_v48  ;;  %351 = vst [vmem:[%s2081_s28 + $0x94] sm:$0xf] %v350_v49  ;;  %v354_v51 = vld [vmem:[%s2076_s27 + $0x138] sm:$0xf] }
  0x52   : > { %353 = vst [vmem:[%s2081_s28 + $0x98] sm:$0xf] %v352_v50  ;;  %v356_v52 = vld [vmem:[%s2076_s27 + $0x140] sm:$0xf]  ;;  %v358_v53 = vld [vmem:[%s2076_s27 + $0x148] sm:$0xf] }
  0x53   : > { %355 = vst [vmem:[%s2081_s28 + $0x9c] sm:$0xf] %v354_v51  ;;  %357 = vst [vmem:[%s2081_s28 + $0xa0] sm:$0xf] %v356_v52  ;;  %v360_v54 = vld [vmem:[%s2076_s27 + $0x150] sm:$0xf] }
  0x54   : > { %359 = vst [vmem:[%s2081_s28 + $0xa4] sm:$0xf] %v358_v53  ;;  %v362_v55 = vld [vmem:[%s2076_s27 + $0x158] sm:$0xf]  ;;  %v364_v56 = vld [vmem:[%s2076_s27 + $0x160] sm:$0xf] }
  0x55   : > { %361 = vst [vmem:[%s2081_s28 + $0xa8] sm:$0xf] %v360_v54  ;;  %363 = vst [vmem:[%s2081_s28 + $0xac] sm:$0xf] %v362_v55  ;;  %v366_v57 = vld [vmem:[%s2076_s27 + $0x168] sm:$0xf] }
  0x56   : > { %365 = vst [vmem:[%s2081_s28 + $0xb0] sm:$0xf] %v364_v56  ;;  %v368_v58 = vld [vmem:[%s2076_s27 + $0x170] sm:$0xf]  ;;  %v370_v59 = vld [vmem:[%s2076_s27 + $0x178] sm:$0xf] }
  0x57   : > { %367 = vst [vmem:[%s2081_s28 + $0xb4] sm:$0xf] %v366_v57  ;;  %369 = vst [vmem:[%s2081_s28 + $0xb8] sm:$0xf] %v368_v58  ;;  %v372_v60 = vld [vmem:[%s2076_s27 + $0x180] sm:$0xf] }
  0x58   : > { %371 = vst [vmem:[%s2081_s28 + $0xbc] sm:$0xf] %v370_v59  ;;  %v374_v61 = vld [vmem:[%s2076_s27 + $0x188] sm:$0xf]  ;;  %v376_v62 = vld [vmem:[%s2076_s27 + $0x190] sm:$0xf] }
  0x59   : > { %373 = vst [vmem:[%s2081_s28 + $0xc0] sm:$0xf] %v372_v60  ;;  %375 = vst [vmem:[%s2081_s28 + $0xc4] sm:$0xf] %v374_v61  ;;  %v378_v63 = vld [vmem:[%s2076_s27 + $0x198] sm:$0xf] }
  0x5a   : > { %377 = vst [vmem:[%s2081_s28 + $0xc8] sm:$0xf] %v376_v62  ;;  %v380_v0 = vld [vmem:[%s2076_s27 + $0x1a0] sm:$0xf]  ;;  %v382_v1 = vld [vmem:[%s2076_s27 + $0x1a8] sm:$0xf] }
  0x5b   : > { %379 = vst [vmem:[%s2081_s28 + $0xcc] sm:$0xf] %v378_v63  ;;  %381 = vst [vmem:[%s2081_s28 + $0xd0] sm:$0xf] %v380_v0  ;;  %v384_v2 = vld [vmem:[%s2076_s27 + $0x1b0] sm:$0xf] }
  0x5c   : > { %383 = vst [vmem:[%s2081_s28 + $0xd4] sm:$0xf] %v382_v1  ;;  %v386_v3 = vld [vmem:[%s2076_s27 + $0x1b8] sm:$0xf]  ;;  %v388_v4 = vld [vmem:[%s2076_s27 + $0x1c0] sm:$0xf] }
  0x5d   : > { %385 = vst [vmem:[%s2081_s28 + $0xd8] sm:$0xf] %v384_v2  ;;  %387 = vst [vmem:[%s2081_s28 + $0xdc] sm:$0xf] %v386_v3  ;;  %v390_v5 = vld [vmem:[%s2076_s27 + $0x1c8] sm:$0xf] }
  0x5e   : > { %389 = vst [vmem:[%s2081_s28 + $0xe0] sm:$0xf] %v388_v4  ;;  %v392_v6 = vld [vmem:[%s2076_s27 + $0x1d0] sm:$0xf]  ;;  %v394_v7 = vld [vmem:[%s2076_s27 + $0x1d8] sm:$0xf] }
  0x5f   : > { %391 = vst [vmem:[%s2081_s28 + $0xe4] sm:$0xf] %v390_v5  ;;  %393 = vst [vmem:[%s2081_s28 + $0xe8] sm:$0xf] %v392_v6  ;;  %v396_v8 = vld [vmem:[%s2076_s27 + $0x1e0] sm:$0xf] }
  0x60   : > { %395 = vst [vmem:[%s2081_s28 + $0xec] sm:$0xf] %v394_v7  ;;  %v398_v9 = vld [vmem:[%s2076_s27 + $0x1e8] sm:$0xf]  ;;  %v400_v10 = vld [vmem:[%s2076_s27 + $0x1f0] sm:$0xf] }
  0x61   : > { %397 = vst [vmem:[%s2081_s28 + $0xf0] sm:$0xf] %v396_v8  ;;  %399 = vst [vmem:[%s2081_s28 + $0xf4] sm:$0xf] %v398_v9  ;;  %v402_v11 = vld [vmem:[%s2076_s27 + $0x1f8] sm:$0xf] }
  0x62   : > { %401 = vst [vmem:[%s2081_s28 + $0xf8] sm:$0xf] %v400_v10  ;;  %v404_v12 = vld [vmem:[%s2076_s27 + $0x200] sm:$0xf]  ;;  %v406_v13 = vld [vmem:[%s2076_s27 + $0x208] sm:$0xf] }
  0x63   : > { %403 = vst [vmem:[%s2081_s28 + $0xfc] sm:$0xf] %v402_v11  ;;  %405 = vst [vmem:[%s2081_s28 + $0x100] sm:$0xf] %v404_v12  ;;  %v408_v14 = vld [vmem:[%s2076_s27 + $0x210] sm:$0xf] }
  0x64   : > { %407 = vst [vmem:[%s2081_s28 + $0x104] sm:$0xf] %v406_v13  ;;  %v410_v15 = vld [vmem:[%s2076_s27 + $0x218] sm:$0xf]  ;;  %v412_v16 = vld [vmem:[%s2076_s27 + $0x220] sm:$0xf] }
  0x65   : > { %409 = vst [vmem:[%s2081_s28 + $0x108] sm:$0xf] %v408_v14  ;;  %411 = vst [vmem:[%s2081_s28 + $0x10c] sm:$0xf] %v410_v15  ;;  %v414_v17 = vld [vmem:[%s2076_s27 + $0x228] sm:$0xf] }
  0x66   : > { %413 = vst [vmem:[%s2081_s28 + $0x110] sm:$0xf] %v412_v16  ;;  %v416_v18 = vld [vmem:[%s2076_s27 + $0x230] sm:$0xf]  ;;  %v418_v19 = vld [vmem:[%s2076_s27 + $0x238] sm:$0xf] }
  0x67   : > { %415 = vst [vmem:[%s2081_s28 + $0x114] sm:$0xf] %v414_v17  ;;  %417 = vst [vmem:[%s2081_s28 + $0x118] sm:$0xf] %v416_v18  ;;  %v420_v20 = vld [vmem:[%s2076_s27 + $0x240] sm:$0xf] }
  0x68   : > { %419 = vst [vmem:[%s2081_s28 + $0x11c] sm:$0xf] %v418_v19  ;;  %v422_v21 = vld [vmem:[%s2076_s27 + $0x248] sm:$0xf]  ;;  %v424_v22 = vld [vmem:[%s2076_s27 + $0x250] sm:$0xf] }
  0x69   : > { %421 = vst [vmem:[%s2081_s28 + $0x120] sm:$0xf] %v420_v20  ;;  %423 = vst [vmem:[%s2081_s28 + $0x124] sm:$0xf] %v422_v21  ;;  %v426_v23 = vld [vmem:[%s2076_s27 + $0x258] sm:$0xf] }
  0x6a   : > { %425 = vst [vmem:[%s2081_s28 + $0x128] sm:$0xf] %v424_v22  ;;  %v428_v24 = vld [vmem:[%s2076_s27 + $0x260] sm:$0xf]  ;;  %v430_v25 = vld [vmem:[%s2076_s27 + $0x268] sm:$0xf] }
  0x6b   : > { %427 = vst [vmem:[%s2081_s28 + $0x12c] sm:$0xf] %v426_v23  ;;  %429 = vst [vmem:[%s2081_s28 + $0x130] sm:$0xf] %v428_v24  ;;  %v432_v26 = vld [vmem:[%s2076_s27 + $0x270] sm:$0xf] }
  0x6c   : > { %431 = vst [vmem:[%s2081_s28 + $0x134] sm:$0xf] %v430_v25  ;;  %v434_v27 = vld [vmem:[%s2076_s27 + $0x278] sm:$0xf]  ;;  %433 = vst [vmem:[%s2081_s28 + $0x138] sm:$0xf] %v432_v26 }
  0x6d   : > { %435 = vst [vmem:[%s2081_s28 + $0x13c] sm:$0xf] %v434_v27 }
  0x6e PF: > { %625 = sbr.rel (!%p2052_p11) target bundleno = 116 (0x74), region = 91  ;;  %s627_s0 = sand.u32 (%p2052_p11), 1, %s1888_s16  }
  0x6f   : > { %s1542_s10 = sshll.u32 (%p2052_p11), %s1920_s24, 3  ;;  %s1541_s26 = sshll.u32 (%p2052_p11), %s627_s0, 5 }
  0x70   : > { %s634_s6 = scalar_lea.vmem (%p2052_p11), %s2379_s3, %s1542_s10  ;;  %s629_s8 = scalar_lea.vmem (%p2052_p11), [#allocation5], %s1541_s26 }
  0x71   : > { %v669_v28 = vld [vmem:[%s634_s6] sm:$0xff] (%p2052_p11)  ;;  %v671_v29 = vld [vmem:[%s634_s6 + $0x10] sm:$0xff] (%p2052_p11) }
  0x72   : > { %v673_v30 = vld [vmem:[%s634_s6 + $0x20] sm:$0xff] (%p2052_p11)  ;;  %670 = vst [vmem:[%s629_s8] sm:$0xff] (%p2052_p11), %v669_v28  ;;  %672 = vst [vmem:[%s629_s8 + $0x8] sm:$0xff] (%p2052_p11), %v671_v29  ;;  %v675_v31 = vld [vmem:[%s634_s6 + $0x30] sm:$0xff] (%p2052_p11) }
  0x73   : > { %674 = vst [vmem:[%s629_s8 + $0x10] sm:$0xff] %v673_v30  ;;  %676 = vst [vmem:[%s629_s8 + $0x18] sm:$0xff] %v675_v31 }
  0x74 PF: > { %p1543_p1 = scmp.ge.s32.totalorder %s1924_s25, 1  ;;  %p681_p2 = scmp.lt.s32.totalorder %s1924_s25, 11 }
  0x76   : > { %p682_p3 = pnand %p1543_p1, %p681_p2 }
  0x77   : > { %s688_s27 = sand.u32 (!%p682_p3), 1, %s1900_s19   ;;  %s695_s14 = sand.u32 (!%p682_p3), 1, %s1892_s17  }
  0x78   : > { %685 = sbr.rel (%p682_p3) target bundleno = 429 (0x1ad), region = 129  ;;  %s702_s11 = sand.u32 (!%p682_p3), 1, %s1884_s15  }
  0x79   : > { %s1693_s9 = smul.u32 (!%p682_p3), 80, %s688_s27  ;;  %s1544_s0 = sshll.u32 (!%p682_p3), %s702_s11, 5 }
  0x7a   : > { %s1694_s28 = smul.u32 (!%p682_p3), 320, %s695_s14  ;;  %p740_p4 = scmp.lt.s32.totalorder (!%p682_p3), %s1912_s22, 1 }
  0x7b   : > { %s2260_s6 = scalar_lea.vmem (!%p682_p3), [#allocation3], %s1693_s9  ;;  %s2264_s1 = scalar_lea.vmem (!%p682_p3), [#allocation5], %s1544_s0 }
  0x7c   : > { %s2262_s8 = scalar_lea.vmem (!%p682_p3), [#allocation4], %s1694_s28  ;;  %s2266_s19 = scalar_lea.vmem (!%p682_p3), [#allocation6], %s1544_s0 }
  0x7d   : > { %s2254_s10 = scalar_select %p740_p4, %s1912_s22, 1 }
  0x7e   : > { %p1546_p5 = scmp.ne.s32.totalorder %s1908_s21, 0 }
  0x7f   : > { %s742_s30 = scalar_lea.vmem %s2378_s2, %s2254_s10 }
  0x80   : > { %749 = sbr.rel (%p1546_p5) target bundleno = 136 (0x88), region = 145 }
  0x85   : > { %v1926_v32 = vmov 0.0  }
  0x86   : > { %750 = vst [vmem:[#allocation2 + $0x10] sm:$0xff] %v1926_v32  ;;  %751 = vst [vmem:[#allocation2] sm:$0xff] %v1926_v32 }
  0x87   : > { %752 = vst [vmem:[#allocation2 + $0x18] sm:$0xff] %v1926_v32  ;;  %753 = vst [vmem:[#allocation2 + $0x8] sm:$0xff] %v1926_v32 }
  0x88 PF: > { %v1784_v33 = vld [vmem:[%s2262_s8 + $0x78] sm:$0xff]   ;;  %v1788_v37 = vld [vmem:[%s2262_s8 + $0x70] sm:$0xff]   ;;  %v1792_v41 = vld [vmem:[%s2262_s8 + $0x68] sm:$0xff]   ;;  %p1597_p6 = scmp.ne.s32.totalorder %s1908_s21, 4 }
  0x89   : > { %v1785_v34 = vld [vmem:[%s2262_s8 + $0xf8] sm:$0xff]   ;;  %1605 = vmatprep.subr.bf16.mxu0 %v1784_v33  ;;  %v1789_v38 = vld [vmem:[%s2262_s8 + $0xf0] sm:$0xff]   ;;  %v1793_v42 = vld [vmem:[%s2262_s8 + $0xe8] sm:$0xff]  }
  0x8a   : > { %v1786_v35 = vld [vmem:[%s2262_s8 + $0x38] sm:$0xff]   ;;  %1633 = vmatprep.subr.bf16.mxu1 %v1785_v34  ;;  %v1790_v39 = vld [vmem:[%s2262_s8 + $0x30] sm:$0xff]   ;;  %v1794_v43 = vld [vmem:[%s2262_s8 + $0x28] sm:$0xff]  }
  0x8b   : > { %v1787_v36 = vld [vmem:[%s2262_s8 + $0xb8] sm:$0xff]   ;;  %1606 = vmatpush3.bf16.msra.mxu0 %v1786_v35  ;;  %v1791_v40 = vld [vmem:[%s2262_s8 + $0xb0] sm:$0xff]   ;;  %v1795_v44 = vld [vmem:[%s2262_s8 + $0xa8] sm:$0xff]  }
  0x8c   : > { %1634 = vmatpush3.bf16.msra.mxu1 %v1787_v36  ;;  %1607 = vmatprep.subr.bf16.mxu0 %v1788_v37  ;;  %v1796_v45 = vld [vmem:[%s2262_s8 + $0x60] sm:$0xff]   ;;  %v1800_v49 = vld [vmem:[%s2262_s8 + $0x58] sm:$0xff]   ;;  %v1804_v53 = vld [vmem:[%s2262_s8 + $0x50] sm:$0xff]  }
  0x8d   : > { %1635 = vmatprep.subr.bf16.mxu1 %v1789_v38  ;;  %v1797_v46 = vld [vmem:[%s2262_s8 + $0xe0] sm:$0xff]   ;;  %v1801_v50 = vld [vmem:[%s2262_s8 + $0xd8] sm:$0xff]   ;;  %v1805_v54 = vld [vmem:[%s2262_s8 + $0xd0] sm:$0xff]  }
  0x8e   : > { %v1798_v47 = vld [vmem:[%s2262_s8 + $0x20] sm:$0xff]   ;;  %v1802_v51 = vld [vmem:[%s2262_s8 + $0x18] sm:$0xff]   ;;  %v1806_v55 = vld [vmem:[%s2262_s8 + $0x10] sm:$0xff]  }
  0x8f   : > { %1608 = vmatpush3.bf16.msra.mxu0 %v1790_v39  ;;  %v1799_v48 = vld [vmem:[%s2262_s8 + $0xa0] sm:$0xff]   ;;  %v1803_v52 = vld [vmem:[%s2262_s8 + $0x98] sm:$0xff]   ;;  %v1807_v56 = vld [vmem:[%s2262_s8 + $0x90] sm:$0xff]  }
  0x90   : > { %1636 = vmatpush3.bf16.msra.mxu1 %v1791_v40  ;;  %1609 = vmatprep.subr.bf16.mxu0 %v1792_v41  ;;  %v1808_v57 = vld [vmem:[%s2262_s8 + $0x48] sm:$0xff]   ;;  %v1812_v61 = vld [vmem:[%s2262_s8 + $0x40] sm:$0xff]   ;;  %v1822_v5 = vld [vmem:[%s2262_s8 + $0x138] sm:$0xff]  }
  0x91   : > { %1637 = vmatprep.subr.bf16.mxu1 %v1793_v42  ;;  %v1809_v58 = vld [vmem:[%s2262_s8 + $0xc8] sm:$0xff]   ;;  %v1813_v62 = vld [vmem:[%s2262_s8 + $0xc0] sm:$0xff]   ;;  %v1823_v6 = vld [vmem:[%s2262_s8 + $0x130] sm:$0xff]  }
  0x92   : > { %v1810_v59 = vld [vmem:[%s2262_s8 + $0x8] sm:$0xff]   ;;  %v1814_v63 = vld [vmem:[%s2262_s8] sm:$0xff]   ;;  %v1826_v14 = vld [vmem:[%s2262_s8 + $0x118] sm:$0xff]  }
  0x93   : > { %1610 = vmatpush3.bf16.msra.mxu0 %v1794_v43  ;;  %v1811_v60 = vld [vmem:[%s2262_s8 + $0x88] sm:$0xff]   ;;  %v1815_v0 = vld [vmem:[%s2262_s8 + $0x80] sm:$0xff]   ;;  %v1833_v15 = vld [vmem:[%s2262_s8 + $0x110] sm:$0xff]  }
  0x94   : > { %1638 = vmatpush3.bf16.msra.mxu1 %v1795_v44  ;;  %1611 = vmatprep.subr.bf16.mxu0 %v1796_v45  ;;  %v1816_v1 = vld [vmem:[%s2260_s6] ss:$20 sps:$4 sm:$0xff]   ;;  %v1818_v2 = vld [vmem:[%s2260_s6 + $0x4] ss:$20 sps:$4 sm:$0xff]   ;;  %v1819_v3 = vld [vmem:[%s2260_s6 + $0x8] ss:$20 sps:$4 sm:$0xff]  }
  0x95   : > { %1639 = vmatprep.subr.bf16.mxu1 %v1797_v46  ;;  %v1821_v4 = vld [vmem:[%s2260_s6 + $0xc] ss:$20 sps:$4 sm:$0xff]   ;;  %1174 = vmatprep.mubr.bf16.mxu0 %v1818_v2  ;;  %v1829_v9 = vld [vmem:[%s2260_s6 + $0x34] ss:$20 sps:$4 sm:$0xff]   ;;  %v1832_v11 = vld [vmem:[%s2260_s6 + $0x30] ss:$20 sps:$4 sm:$0xff]  }
  0x96   : > { %1223 = vmatprep.mubr.bf16.mxu1 %v1821_v4  ;;  %v1824_v7 = vld [vmem:[%s2262_s8 + $0x128] sm:$0xff]   ;;  %v1825_v12 = vld [vmem:[%s2262_s8 + $0x120] sm:$0xff]   ;;  %v756_v42 = vld [vmem:[#allocation2 + $0x18] sm:$0xff] }
  0x97   : > { %1612 = vmatpush3.bf16.msra.mxu0 %v1798_v47  ;;  %v1827_v8 = vld [vmem:[%s2260_s6 + $0x2c] ss:$20 sps:$4 sm:$0xff]   ;;  %v1831_v10 = vld [vmem:[%s2260_s6 + $0x28] ss:$20 sps:$4 sm:$0xff]   ;;  %v1836_v13 = vld [vmem:[%s2260_s6 + $0x10] ss:$20 sps:$4 sm:$0xff]  }
  0x98   : > { %1640 = vmatpush3.bf16.msra.mxu1 %v1799_v48  ;;  %1613 = vmatprep.subr.bf16.mxu0 %v1800_v49  ;;  %v1834_v16 = vld [vmem:[%s2262_s8 + $0x108] sm:$0xff]   ;;  %v1835_v17 = vld [vmem:[%s2262_s8 + $0x100] sm:$0xff]   ;;  %v754_v48 = vld [vmem:[#allocation2 + $0x10] sm:$0xff] }
  0x99   : > { %1641 = vmatprep.subr.bf16.mxu1 %v1801_v50  ;;  %v1837_v18 = vld [vmem:[%s2260_s6 + $0x38] ss:$20 sps:$4 sm:$0xff]  }
  0x9b   : > { %1614 = vmatpush3.bf16.msra.mxu0 %v1802_v51 }
  0x9c   : > { %1642 = vmatpush3.bf16.msra.mxu1 %v1803_v52  ;;  %1615 = vmatprep.subr.bf16.mxu0 %v1804_v53  ;;  %v757_v53 = vld [vmem:[#allocation2 + $0x8] sm:$0xff] }
  0x9d   : > { %1643 = vmatprep.subr.bf16.mxu1 %v1805_v54 }
  0x9f   : > { %1616 = vmatpush3.bf16.msra.mxu0 %v1806_v55 }
  0xa0   : > { %1644 = vmatpush3.bf16.msra.mxu1 %v1807_v56  ;;  %1617 = vmatprep.subr.bf16.mxu0 %v1808_v57 }
  0xa1   : > { %1645 = vmatprep.subr.bf16.mxu1 %v1809_v58  ;;  %v755_v58 = vld [vmem:[#allocation2] sm:$0xff] }
  0xa3   : > { %1618 = vmatpush3.bf16.msra.mxu0 %v1810_v59 }
  0xa4   : > { %1646 = vmatpush3.bf16.msra.mxu1 %v1811_v60  ;;  %1619 = vmatprep.subr.bf16.mxu0 %v1812_v61 }
  0xa5   : > { %1647 = vmatprep.subr.bf16.mxu1 %v1813_v62 }
  0xa7   : > { %1620 = vmatpush3.bf16.msra.mxu0 %v1814_v63 }
  0xa8   : > { %1648 = vmatpush3.bf16.msra.mxu1 %v1815_v0  ;;  %1671 = vmatprep.subr.bf16.mxu0 %v1822_v5 }
  0xaa   : > { %1175 = vmatmul.mubr.bf16.vlgmr.msra.gmra.mxu0 %v1816_v1 }
  0xab   : > { %1224 = vmatmul.mubr.bf16.vlgmr.msra.gmra.mxu1 %v1819_v3  ;;  %1672 = vmatpush3.bf16.msra.mxu0 %v1822_v5 }
  0xac   : > { %1673 = vmatprep.subr.bf16.mxu0 %v1823_v6  ;;  %1182 = vmatprep.mubr.bf16.mxu0 %v1827_v8 }
  0xad   : > { %1231 = vmatprep.mubr.bf16.mxu1 %v1829_v9 }
  0xaf   : > { %1674 = vmatpush3.bf16.msra.mxu0 %v1823_v6 }
  0xb0   : > { %1675 = vmatprep.subr.bf16.mxu0 %v1824_v7 }
  0xb2   : > { %1183 = vmatmul.mubr.bf16.gmra.mxu0 %v1831_v10 }
  0xb3   : > { %1232 = vmatmul.mubr.bf16.gmra.mxu1 %v1832_v11  ;;  %1676 = vmatpush3.bf16.msra.mxu0 %v1824_v7 }
  0xb4   : > { %1677 = vmatprep.subr.bf16.mxu0 %v1825_v12  ;;  %1687 = vmatprep.mubr.bf16.mxu0 %v1836_v13 }
  0xb7   : > { %1678 = vmatpush3.bf16.msra.mxu0 %v1825_v12 }
  0xb8   : > { %1679 = vmatprep.subr.bf16.mxu0 %v1826_v14 }
  0xbb   : > { %1680 = vmatpush3.bf16.msra.mxu0 %v1826_v14 }
  0xbc   : > { %1681 = vmatprep.subr.bf16.mxu0 %v1833_v15 }
  0xbf   : > { %1682 = vmatpush3.bf16.msra.mxu0 %v1833_v15 }
  0xc0   : > { %1683 = vmatprep.subr.bf16.mxu0 %v1834_v16 }
  0xc3   : > { %1684 = vmatpush3.bf16.msra.mxu0 %v1834_v16 }
  0xc4   : > { %1685 = vmatprep.subr.bf16.mxu0 %v1835_v17 }
  0xc7   : > { %1686 = vmatpush3.bf16.msra.mxu0 %v1835_v17 }
  0xca   : > { %1688 = vmatmul.mubr.bf16.vlgmr.msra.gmra.mxu0 %v1837_v18 }
 0x16a   : > { %v1621_v19 = vpop.f32.mrf.mxu0 }
 0x16b   : > { %v1649_v20 = vpop.f32.mrf.mxu1 }
 0x16c   : > { %v1622_v21 = vpop.f32.mrf.mxu0 }
 0x16d   : > { %v1650_v22 = vpop.f32.mrf.mxu1  ;;  %v1623_v37 = vadd.f32 %v1622_v21, %v1621_v19 }
 0x16e   : > { %v1624_v23 = vpop.f32.mrf.mxu0  ;;  %v1651_v38 = vadd.f32 %v1650_v22, %v1649_v20 }
 0x16f   : > { %v1652_v24 = vpop.f32.mrf.mxu1 }
 0x170   : > { %v1625_v25 = vpop.f32.mrf.mxu0  ;;  %v1226_v47 = vadd.f32 %v1651_v38, %v1623_v37 }
 0x171   : > { %v1653_v26 = vpop.f32.mrf.mxu1  ;;  %v1626_v44 = vadd.f32 %v1625_v25, %v1624_v23 }
 0x172   : > { %v1627_v27 = vpop.f32.mrf.mxu0  ;;  %v1654_v45 = vadd.f32 %v1653_v26, %v1652_v24 }
 0x173   : > { %v1655_v28 = vpop.f32.mrf.mxu1 }
 0x174   : > { %v1628_v29 = vpop.f32.mrf.mxu0  ;;  %v1229_v57 = vadd.f32 %v1654_v45, %v1626_v44 }
 0x175   : > { %v1656_v30 = vpop.f32.mrf.mxu1  ;;  %v1629_v33 = vadd.f32 %v1628_v29, %v1627_v27 }
 0x176   : > { %v1630_v31 = vpop.f32.mrf.mxu0  ;;  %v1657_v34 = vadd.f32 %v1656_v30, %v1655_v28 }
 0x177   : > { %v1658_v32 = vpop.f32.mrf.mxu1 }
 0x178   : > { %v1631_v35 = vpop.f32.mrf.mxu0  ;;  %v1234_v41 = vadd.f32 %v1657_v34, %v1629_v33 }
 0x179   : > { %v1659_v36 = vpop.f32.mrf.mxu1  ;;  %v1632_v39 = vadd.f32 %v1631_v35, %v1630_v31 }
 0x17a   : > { %v1660_v40 = vadd.f32 %v1659_v36, %v1658_v32 }
 0x17c   : > { %v1237_v52 = vadd.f32 %v1660_v40, %v1632_v39 }
 0x18a   : > { %v1689_v43 = vpop.f32.mrf.mxu0 }
 0x18b   : > { %v1283_v46 = vadd.f32 %v1689_v43, %v1234_v41 }
 0x18c   : > { %v1274_v49 = vpop.f32.mrf.mxu0 }
 0x18d   : > { %v1291_v50 = vadd.f32 %v1283_v46, %v756_v42  ;;  %v1275_v51 = vadd.f32 %v1274_v49, %v1226_v47 }
 0x18e   : > { %v1690_v54 = vpop.f32.mrf.mxu0 }
 0x18f   : > { %1295 = vst [vmem:[#allocation2 + $0x18] sm:$0xff] %v1291_v50  ;;  %v1289_v55 = vadd.f32 %v1275_v51, %v754_v48  ;;  %v1286_v56 = vadd.f32 %v1690_v54, %v1237_v52 }
 0x190   : > { %v1277_v59 = vpop.f32.mrf.mxu0 }
 0x191   : > { %1293 = vst [vmem:[#allocation2 + $0x10] sm:$0xff] %v1289_v55  ;;  %v1292_v60 = vadd.f32 %v1286_v56, %v757_v53  ;;  %v1278_v61 = vadd.f32 %v1277_v59, %v1229_v57  ;;  %1300 = sbr.rel (%p1597_p6) target bundleno = 421 (0x1a5), region = 149 }
 0x193   : > { %1296 = vst [vmem:[#allocation2 + $0x8] sm:$0xff] %v1292_v60  ;;  %v1290_v62 = vadd.f32 %v1278_v61, %v755_v58 }
 0x195   : > { %1294 = vst [vmem:[#allocation2] sm:$0xff] %v1290_v62 }
 0x196   : > { %v1598_v0 = vld [vmem:[%s742_s30] ss:$0 sm:$0xff]  ;;  %v1303_v3 = vld [vmem:[#allocation2 + $0x18] sm:$0xff]  ;;  %v1329_v9 = vld [vmem:[%s2264_s1 + $0x8] sm:$0xff] }
 0x197   : > { %v1314_v5 = vadd.f32 %v1598_v0, %v1303_v3  ;;  %v1328_v8 = vld [vmem:[%s2264_s1] sm:$0xff]  ;;  %v1330_v10 = vld [vmem:[%s2264_s1 + $0x10] sm:$0xff]  ;;  %v1331_v16 = vld [vmem:[%s2264_s1 + $0x18] sm:$0xff] }
 0x198   : > { %v1301_v63 = vld [vmem:[#allocation2 + $0x10] sm:$0xff] }
 0x199   : > { %v1312_v1 = vadd.f32 %v1598_v0, %v1301_v63  ;;  %vm1318_vm2 = vcmp.ge.f32.partialorder %v1314_v5, 0.0  ;;  %v1322_v13 = vmul.f32 0.02, %v1314_v5 }
 0x19a   : > { %v1304_v6 = vld [vmem:[#allocation2 + $0x8] sm:$0xff] }
 0x19b   : > { %vm1316_vm0 = vcmp.ge.f32.partialorder %v1312_v1, 0.0  ;;  %v1320_v7 = vmul.f32 0.02, %v1312_v1  ;;  %v1315_v11 = vadd.f32 %v1598_v0, %v1304_v6  ;;  %v1326_v19 = vsel %vm1318_vm2, %v1314_v5, %v1322_v13 }
 0x19c   : > { %v1302_v2 = vld [vmem:[#allocation2] sm:$0xff]  ;;  %v1334_v21 = vadd.f32 %v1330_v10, %v1326_v19 }
 0x19d   : > { %v1313_v4 = vadd.f32 %v1598_v0, %v1302_v2  ;;  %v1324_v14 = vsel %vm1316_vm0, %v1312_v1, %v1320_v7  ;;  %vm1319_vm3 = vcmp.ge.f32.partialorder %v1315_v11, 0.0  ;;  %v1323_v15 = vmul.f32 0.02, %v1315_v11 }
 0x19e   : > { %v1332_v17 = vadd.f32 %v1328_v8, %v1324_v14  ;;  %1338 = vst [vmem:[%s2266_s19 + $0x10] sm:$0xff] %v1334_v21 }
 0x19f   : > { %vm1317_vm1 = vcmp.ge.f32.partialorder %v1313_v4, 0.0  ;;  %v1321_v12 = vmul.f32 0.02, %v1313_v4  ;;  %v1327_v22 = vsel %vm1319_vm3, %v1315_v11, %v1323_v15 }
 0x1a0   : > { %1336 = vst [vmem:[%s2266_s19] sm:$0xff] %v1332_v17  ;;  %v1335_v23 = vadd.f32 %v1331_v16, %v1327_v22 }
 0x1a1   : > { %v1325_v18 = vsel %vm1317_vm1, %v1313_v4, %v1321_v12 }
 0x1a2   : > { %v1333_v20 = vadd.f32 %v1329_v9, %v1325_v18  ;;  %1339 = vst [vmem:[%s2266_s19 + $0x18] sm:$0xff] %v1335_v23 }
 0x1a4   : > { %1337 = vst [vmem:[%s2266_s19 + $0x8] sm:$0xff] %v1333_v20 }
 0x1a5 PF: > { %1346 = sbr.rel (!%p2056_p13) target bundleno = 429 (0x1ad), region = 153  ;;  %s1600_s1 = sshll.u32 (%p2056_p13), %s1912_s22, 3  ;;  %v1390_v26 = vld [vmem:[%s2266_s19 + $0x10] sm:$0xff] (%p2056_p13) }
 0x1a6   : > { %s1351_s14 = scalar_lea.vmem (%p2056_p13), %s2380_s4, %s1600_s1 }
 0x1a7   : > { %v1386_v24 = vld [vmem:[%s2266_s19] sm:$0xff] (%p2056_p13)  ;;  %1391 = vst [vmem:[%s1351_s14 + $0x20] sm:$0xff] (%p2056_p13), %v1390_v26 }
 0x1a8   : > { %1387 = vst [vmem:[%s1351_s14] sm:$0xff] (%p2056_p13), %v1386_v24 }
 0x1a9   : > { %v1392_v27 = vld [vmem:[%s2266_s19 + $0x18] sm:$0xff] (%p2056_p13) }
 0x1aa   : > { %1393 = vst [vmem:[%s1351_s14 + $0x30] sm:$0xff] %v1392_v27 }
 0x1ab   : > { %v1388_v25 = vld [vmem:[%s2266_s19 + $0x8] sm:$0xff] }
 0x1ac   : > { %1389 = vst [vmem:[%s1351_s14 + $0x10] sm:$0xff] %v1388_v25 }
 0x1ad PF: > { %s14_s25 = sadd.s32 1, %s1924_s25   ;;  %s2393_s29 = sld [smem:[#allocation7_spill]] }
 0x1ae   : > { %p11_p7 = scmp.ge.s32.totalorder %s14_s25, 12   ;;  %s2394_s9 = sld [smem:[#allocation8_spill]] }
 0x1af   : > { %s2395_s15 = smov %s1888_s16  ;;  %s2396_s16 = smov %s2048_s13 }
 0x1b0   : > { %s2397_s17 = smov %s1896_s18  ;;  %s2398_s18 = smov %s2045_s12 }
 0x1b1   : > { %s2399_s19 = smov %s1904_s20  ;;  %s2400_s20 = smov %s2029_s7 }
 0x1b2   : > { %s2401_s21 = smov %s1916_s23  ;;  %s2402_s22 = smov %s1920_s24 }
 0x1b3   : > { %s2403_s23 = smov %s2393_s29  ;;  %13 = sbr.rel (!%p11_p7) target bundleno = 9 (0x9), region = 247 }
 0x1b4   : > { %s2404_s24 = smov %s2394_s9 }

// kernel: disc_low_forward.9
= control target key start
LH: loop header
LB: loop body
LE: loop exit
PB: predicated region body
PF: predicated region fallthrough
CT: control target
= control target key end

     0   :  { %s1205_s12 = smov 0   ;;  %s1207_s13 = smov 0   ;;  %s1330_s0 = inlined_call_operand.vmem [shape: bf16[16,6400], index: 0, kind: input, shape index: {}]   ;;  %s1331_s1 = inlined_call_operand.vmem [shape: bf16[6400,128], index: 1, kind: input, shape index: {}]   ;;  %s1332_s2 = inlined_call_operand.vmem [shape: f32[1,128], index: 2, kind: input, shape index: {}]   ;;  %s1333_s3 = inlined_call_operand.vmem [shape: f32[16,128], index: 3, kind: output, shape index: {}]  }
   0x1   :  { %s1209_s14 = smov 0   ;;  %s1211_s15 = smov 0  }
   0x2   :  { %s1213_s16 = smov 0  }
   0x3 LB: > { %s25_s17 = sadd.s32 1, %s1176_s15  ;;  %p48_p1 = scmp.ne.s32.totalorder %s1168_s13, %s1164_s12  ;;  %s1180_s16 = sphi %s1213_s16, %s13_s16   ;;  %s1176_s15 = sphi %s1211_s15, %s1337_s15   ;;  %s1172_s14 = sphi %s1209_s14, %s1336_s14   ;;  %s1168_s13 = sphi %s1207_s13, %s1335_s13   ;;  %s1164_s12 = sphi %s1205_s12, %s1334_s12  }
   0x4   : > { %p26_p0 = scmp.ge.s32.totalorder %s25_s17, 10  ;;  %p49_p2 = scmp.eq.s32.totalorder %s1180_s16, 0 }
   0x5   : > { %s41_s19 = sadd.s32 1, %s1168_s13  ;;  %p916_p5 = scmp.ge.s32.totalorder %s1180_s16, 10 }
   0x6   : > { %s1339_s17 = smov (%p26_p0, %s25_s17), 0  ;;  %p50_p3 = por %p49_p2, %p48_p1 }
   0x7   : > { %s37_s18 = ssub.s32 %s1176_s15, %s1339_s17  ;;  %162 = sbr.rel (%p916_p5) target bundleno = 20 (0x14), region = 20 }
   0x8   : > { %p39_p4 = scmp.eq.s32.totalorder %s37_s18, 0 }
   0xa   : > { %s1240_s20 = scalar_select %p39_p4, %s1168_s13, %s41_s19  }
   0xc   : > { %165 = sbr.rel (!%p50_p3) target bundleno = 20 (0x14), region = 24  ;;  %s167_s21 = sand.u32 (%p50_p3), 1, %s1168_s13  }
   0xd   : > { %s976_s22 = smul.u32 (%p50_p3), 20, %s1176_s15 }
   0xe   : > { %s1050_s23 = smul.u32 (%p50_p3), 40, %s167_s21 }
   0xf   : > { %s175_s26 = scalar_lea.vmem (%p50_p3), %s1330_s0, %s976_s22 }
  0x10   : > { %v190_v0 = vld [vmem:[%s175_s26] sm:$0xff] (%p50_p3)  ;;  %v192_v1 = vld [vmem:[%s175_s26 + $0x8] sm:$0xff] (%p50_p3)  ;;  %s169_s27 = scalar_lea.vmem (%p50_p3), [#allocation3], %s1050_s23  ;;  %v196_v3 = vld [vmem:[%s175_s26 + $0xd0] sm:$0xff] (%p50_p3) }
  0x11   : > { %v194_v2 = vld [vmem:[%s175_s26 + $0xc8] sm:$0xff]  ;;  %191 = vst [vmem:[%s169_s27] sm:$0xff] %v190_v0  ;;  %193 = vst [vmem:[%s169_s27 + $0x8] sm:$0xff] %v192_v1  ;;  %v918_v4 = vld [vmem:[%s175_s26 + $0x10] sm:$0xf] }
  0x12   : > { %195 = vst [vmem:[%s169_s27 + $0x14] sm:$0xff] %v194_v2  ;;  %v920_v5 = vld [vmem:[%s175_s26 + $0xd8] sm:$0xf]  ;;  %197 = vst [vmem:[%s169_s27 + $0x1c] sm:$0xff] %v196_v3 }
  0x13   : > { %919 = vst [vmem:[%s169_s27 + $0x10] sm:$0xf] %v918_v4  ;;  %921 = vst [vmem:[%s169_s27 + $0x24] sm:$0xf] %v920_v5 }
  0x14 PF: > { %p922_p6 = scmp.ge.s32.totalorder %s1180_s16, 1  ;;  %p226_p7 = scmp.lt.s32.totalorder %s1180_s16, 11 }
  0x16   : > { %p227_p8 = pnand %p922_p6, %p226_p7 }
  0x17   : > { %s233_s28 = sand.u32 (!%p227_p8), 1, %s1164_s12   ;;  %s272_s29 = smul.u32 (!%p227_p8), 80, %s1172_s14 }
  0x18   : > { %230 = sbr.rel (%p227_p8) target bundleno = 314 (0x13a), region = 54  ;;  %p924_p10 = scmp.ne.s32.totalorder (!%p227_p8), %s1172_s14, 0 }
  0x19   : > { %s1051_s30 = smul.u32 (!%p227_p8), 40, %s233_s28  ;;  %p273_p9 = scmp.lt.s32.totalorder (!%p227_p8), %s272_s29, 799 }
  0x1b   : > { %s1257_s8 = scalar_lea.vmem (!%p227_p8), [#allocation3], %s1051_s30 }
  0x1d   : > { %s1341_s29 = smov (!%p273_p9, %s272_s29), 799  ;;  %297 = sbr.rel (%p924_p10) target bundleno = 36 (0x24), region = 62 }
  0x1e   : > { %s923_s4 = sshll.u32 %s1341_s29, 2 }
  0x1f   : > { %s1255_s7 = scalar_lea.vmem %s1331_s1, %s923_s4 }
  0x22   : > { %v1182_v6 = vmov 0.0  }
  0x23   : > { %298 = vst [vmem:[#allocation2] sm:$0xff] %v1182_v6  ;;  %299 = vst [vmem:[#allocation2 + $0x8] sm:$0xff] %v1182_v6 }
  0x24 PF: > { %v1095_v7 = vld [vmem:[%s1255_s7 + $0x78] sm:$0xff]   ;;  %v1099_v11 = vld [vmem:[%s1255_s7 + $0x70] sm:$0xff]   ;;  %v1103_v15 = vld [vmem:[%s1255_s7 + $0x68] sm:$0xff]   ;;  %v1183_v41 = vmov 0.0   ;;  %vm1184_vm0 = vmmov 0   ;;  %p970_p11 = scmp.ne.s32.totalorder %s1172_s14, 9 }
  0x25   : > { %v1096_v8 = vld [vmem:[%s1255_s7 + $0xf8] sm:$0xff]   ;;  %977 = vmatprep.subr.bf16.mxu0 %v1095_v7  ;;  %v1100_v12 = vld [vmem:[%s1255_s7 + $0xf0] sm:$0xff]   ;;  %v1104_v16 = vld [vmem:[%s1255_s7 + $0xe8] sm:$0xff]  }
  0x26   : > { %v1097_v9 = vld [vmem:[%s1255_s7 + $0x38] sm:$0xff]   ;;  %999 = vmatprep.subr.bf16.mxu1 %v1096_v8  ;;  %v1101_v13 = vld [vmem:[%s1255_s7 + $0x30] sm:$0xff]   ;;  %v1105_v17 = vld [vmem:[%s1255_s7 + $0x28] sm:$0xff]  }
  0x27   : > { %v1098_v10 = vld [vmem:[%s1255_s7 + $0xb8] sm:$0xff]   ;;  %978 = vmatpush3.bf16.msra.mxu0 %v1097_v9  ;;  %v1102_v14 = vld [vmem:[%s1255_s7 + $0xb0] sm:$0xff]   ;;  %v1106_v18 = vld [vmem:[%s1255_s7 + $0xa8] sm:$0xff]  }
  0x28   : > { %1000 = vmatpush3.bf16.msra.mxu1 %v1098_v10  ;;  %979 = vmatprep.subr.bf16.mxu0 %v1099_v11  ;;  %v1107_v19 = vld [vmem:[%s1255_s7 + $0x60] sm:$0xff]   ;;  %v1111_v23 = vld [vmem:[%s1255_s7 + $0x58] sm:$0xff]   ;;  %v1115_v27 = vld [vmem:[%s1255_s7 + $0x50] sm:$0xff]  }
  0x29   : > { %1001 = vmatprep.subr.bf16.mxu1 %v1100_v12  ;;  %v1108_v20 = vld [vmem:[%s1255_s7 + $0xe0] sm:$0xff]   ;;  %v1112_v24 = vld [vmem:[%s1255_s7 + $0xd8] sm:$0xff]   ;;  %v1116_v28 = vld [vmem:[%s1255_s7 + $0xd0] sm:$0xff]  }
  0x2a   : > { %v1109_v21 = vld [vmem:[%s1255_s7 + $0x20] sm:$0xff]   ;;  %v1113_v25 = vld [vmem:[%s1255_s7 + $0x18] sm:$0xff]   ;;  %v1117_v29 = vld [vmem:[%s1255_s7 + $0x10] sm:$0xff]  }
  0x2b   : > { %980 = vmatpush3.bf16.msra.mxu0 %v1101_v13  ;;  %v1110_v22 = vld [vmem:[%s1255_s7 + $0xa0] sm:$0xff]   ;;  %v1114_v26 = vld [vmem:[%s1255_s7 + $0x98] sm:$0xff]   ;;  %v1118_v30 = vld [vmem:[%s1255_s7 + $0x90] sm:$0xff]  }
  0x2c   : > { %1002 = vmatpush3.bf16.msra.mxu1 %v1102_v14  ;;  %981 = vmatprep.subr.bf16.mxu0 %v1103_v15  ;;  %v1119_v31 = vld [vmem:[%s1255_s7 + $0x48] sm:$0xff]   ;;  %v1123_v35 = vld [vmem:[%s1255_s7 + $0x40] sm:$0xff]   ;;  %v1133_v44 = vld [vmem:[%s1255_s7 + $0x138] sm:$0xff]  }
  0x2d   : > { %1003 = vmatprep.subr.bf16.mxu1 %v1104_v16  ;;  %v1120_v32 = vld [vmem:[%s1255_s7 + $0xc8] sm:$0xff]   ;;  %v1124_v36 = vld [vmem:[%s1255_s7 + $0xc0] sm:$0xff]   ;;  %v1134_v45 = vld [vmem:[%s1255_s7 + $0x130] sm:$0xff]  }
  0x2e   : > { %v1121_v33 = vld [vmem:[%s1255_s7 + $0x8] sm:$0xff]   ;;  %v1125_v37 = vld [vmem:[%s1255_s7] sm:$0xff]   ;;  %v1137_v48 = vld [vmem:[%s1255_s7 + $0x118] sm:$0xff]  }
  0x2f   : > { %982 = vmatpush3.bf16.msra.mxu0 %v1105_v17  ;;  %v1122_v34 = vld [vmem:[%s1255_s7 + $0x88] sm:$0xff]   ;;  %v1126_v38 = vld [vmem:[%s1255_s7 + $0x80] sm:$0xff]   ;;  %v1138_v49 = vld [vmem:[%s1255_s7 + $0x110] sm:$0xff]  }
  0x30   : > { %1004 = vmatpush3.bf16.msra.mxu1 %v1106_v18  ;;  %983 = vmatprep.subr.bf16.mxu0 %v1107_v19  ;;  %v1127_v39 = vld [vmem:[%s1257_s8] ss:$20 sps:$4 sm:$0xff]   ;;  %v1129_v40 = vld [vmem:[%s1257_s8 + $0x4] ss:$20 sps:$4 sm:$0xff]   ;;  %v1130_v42 = vld [vmem:[%s1257_s8 + $0x8] ss:$20 sps:$4 sm:$0xff]  }
  0x31   : > { %1005 = vmatprep.subr.bf16.mxu1 %v1108_v20  ;;  %v1132_v43 = vld [vmem:[%s1257_s8 + $0xc] ss:$20 sps:$4 sm:$0xff]   ;;  %686 = vmatprep.mubr.bf16.mxu0 %v1129_v40  ;;  %v1135_v46 = vld [vmem:[%s1255_s7 + $0x128] sm:$0xff]  }
  0x32   : > { %727 = vmatprep.mubr.bf16.mxu1 %v1132_v43  ;;  %v1136_v47 = vld [vmem:[%s1255_s7 + $0x120] sm:$0xff]   ;;  %v1139_v50 = vld [vmem:[%s1255_s7 + $0x108] sm:$0xff]  }
  0x33   : > { %984 = vmatpush3.bf16.msra.mxu0 %v1109_v21  ;;  %v1140_v51 = vld [vmem:[%s1255_s7 + $0x100] sm:$0xff]   ;;  %v301_v8 = vld [vmem:[#allocation2 + $0x8] sm:$0xff] }
  0x34   : > { %1006 = vmatpush3.bf16.msra.mxu1 %v1110_v22  ;;  %985 = vmatprep.subr.bf16.mxu0 %v1111_v23  ;;  %v1141_v52 = vld [vmem:[%s1257_s8 + $0x10] ss:$20 sps:$4 sm:$0xff]  }
  0x35   : > { %1007 = vmatprep.subr.bf16.mxu1 %v1112_v24  ;;  %v300_v2 = vld [vmem:[#allocation2] sm:$0xff] }
  0x37   : > { %986 = vmatpush3.bf16.msra.mxu0 %v1113_v25 }
  0x38   : > { %1008 = vmatpush3.bf16.msra.mxu1 %v1114_v26  ;;  %987 = vmatprep.subr.bf16.mxu0 %v1115_v27 }
  0x39   : > { %1009 = vmatprep.subr.bf16.mxu1 %v1116_v28 }
  0x3b   : > { %988 = vmatpush3.bf16.msra.mxu0 %v1117_v29 }
  0x3c   : > { %1010 = vmatpush3.bf16.msra.mxu1 %v1118_v30  ;;  %989 = vmatprep.subr.bf16.mxu0 %v1119_v31 }
  0x3d   : > { %1011 = vmatprep.subr.bf16.mxu1 %v1120_v32 }
  0x3f   : > { %990 = vmatpush3.bf16.msra.mxu0 %v1121_v33 }
  0x40   : > { %1012 = vmatpush3.bf16.msra.mxu1 %v1122_v34  ;;  %991 = vmatprep.subr.bf16.mxu0 %v1123_v35 }
  0x41   : > { %1013 = vmatprep.subr.bf16.mxu1 %v1124_v36 }
  0x43   : > { %992 = vmatpush3.bf16.msra.mxu0 %v1125_v37 }
  0x44   : > { %1014 = vmatpush3.bf16.msra.mxu1 %v1126_v38  ;;  %1030 = vmatprep.subr.bf16.mxu0 %v1183_v41 }
  0x46   : > { %687 = vmatmul.mubr.bf16.vlgmr.msra.gmra.mxu0 %v1127_v39 }
  0x47   : > { %728 = vmatmul.mubr.bf16.vlgmr.msra.gmra.mxu1 %v1130_v42  ;;  %1031 = vmatpush3.bf16.msra.mxu0 %v1133_v44 }
  0x48   : > { %1032 = vmatprep.subr.bf16.mxu0 %v1183_v41  ;;  %1046 = vmatprep.mubr.msk.bf16.mxu0 %vm1184_vm0, %v1183_v41 }
  0x4b   : > { %1033 = vmatpush3.bf16.msra.mxu0 %v1134_v45 }
  0x4c   : > { %1034 = vmatprep.subr.bf16.mxu0 %v1183_v41 }
  0x4f   : > { %1035 = vmatpush3.bf16.msra.mxu0 %v1135_v46 }
  0x50   : > { %1036 = vmatprep.subr.bf16.mxu0 %v1183_v41 }
  0x53   : > { %1037 = vmatpush3.bf16.msra.mxu0 %v1136_v47 }
  0x54   : > { %1038 = vmatprep.subr.bf16.mxu0 %v1183_v41 }
  0x57   : > { %1039 = vmatpush3.bf16.msra.mxu0 %v1137_v48 }
  0x58   : > { %1040 = vmatprep.subr.bf16.mxu0 %v1183_v41 }
  0x5b   : > { %1041 = vmatpush3.bf16.msra.mxu0 %v1138_v49 }
  0x5c   : > { %1042 = vmatprep.subr.bf16.mxu0 %v1183_v41 }
  0x5f   : > { %1043 = vmatpush3.bf16.msra.mxu0 %v1139_v50 }
  0x60   : > { %1044 = vmatprep.subr.bf16.mxu0 %v1183_v41 }
  0x63   : > { %1045 = vmatpush3.bf16.msra.mxu0 %v1140_v51 }
  0x66   : > { %1047 = vmatmul.mubr.bf16.vlgmr.msra.gmra.mxu0 %v1141_v52 }
 0x106   : > { %v993_v53 = vpop.f32.mrf.mxu0 }
 0x107   : > { %v1015_v54 = vpop.f32.mrf.mxu1 }
 0x108   : > { %v994_v55 = vpop.f32.mrf.mxu0 }
 0x109   : > { %v1016_v56 = vpop.f32.mrf.mxu1  ;;  %v995_v59 = vadd.f32 %v994_v55, %v993_v53 }
 0x10a   : > { %v996_v57 = vpop.f32.mrf.mxu0  ;;  %v1017_v60 = vadd.f32 %v1016_v56, %v1015_v54 }
 0x10b   : > { %v1018_v58 = vpop.f32.mrf.mxu1 }
 0x10c   : > { %v997_v61 = vpop.f32.mrf.mxu0  ;;  %v730_v1 = vadd.f32 %v1017_v60, %v995_v59 }
 0x10d   : > { %v1019_v62 = vpop.f32.mrf.mxu1  ;;  %v998_v63 = vadd.f32 %v997_v61, %v996_v57 }
 0x10e   : > { %v1020_v0 = vadd.f32 %v1019_v62, %v1018_v58 }
 0x110   : > { %v733_v7 = vadd.f32 %v1020_v0, %v998_v63 }
 0x126   : > { %v770_v3 = vpop.f32.mrf.mxu0 }
 0x127   : > { %v771_v4 = vadd.f32 %v770_v3, %v730_v1 }
 0x128   : > { %v1048_v5 = vpop.f32.mrf.mxu0 }
 0x129   : > { %v777_v6 = vadd.f32 %v771_v4, %v300_v2 }
 0x12a   : > { %v773_v9 = vpop.f32.mrf.mxu0 }
 0x12b   : > { %779 = vst [vmem:[#allocation2] sm:$0xff] %v777_v6  ;;  %v774_v10 = vadd.f32 %v773_v9, %v733_v7  ;;  %784 = sbr.rel (%p970_p11) target bundleno = 314 (0x13a), region = 66 }
 0x12c   : > { %v1049_v11 = vpop.f32.mrf.mxu0 }
 0x12d   : > { %v778_v12 = vadd.f32 %v774_v10, %v301_v8 }
 0x12f   : > { %780 = vst [vmem:[#allocation2 + $0x8] sm:$0xff] %v778_v12 }
 0x130   : > { %v971_v14 = vld [vmem:[%s1332_s2] ss:$0 sm:$0xff] }
 0x132   : > { %v785_v13 = vld [vmem:[#allocation2] sm:$0xff] }
 0x133   : > { %v794_v16 = vadd.f32 %v971_v14, %v785_v13 }
 0x135   : > { %796 = vst [vmem:[%s1333_s3] sm:$0xff] %v794_v16 }
 0x136   : > { %v786_v15 = vld [vmem:[#allocation2 + $0x8] sm:$0xff] }
 0x137   : > { %v795_v17 = vadd.f32 %v971_v14, %v786_v15 }
 0x139   : > { %797 = vst [vmem:[%s1333_s3 + $0x8] sm:$0xff] %v795_v17 }
 0x13a PF: > { %s13_s16 = sadd.s32 1, %s1180_s16   ;;  %s1334_s12 = smov %s1168_s13 }
 0x13b   : > { %p10_p12 = scmp.ge.s32.totalorder %s13_s16, 12   ;;  %s1335_s13 = smov %s1240_s20 }
 0x13c   : > { %s1336_s14 = smov %s1176_s15  ;;  %s1337_s15 = smov %s1339_s17 }
 0x13d   :  { %12 = sbr.rel (!%p10_p12) target bundleno = 3 (0x3), region = 113 }

</bundles_post_ra>
